<compile_context>
chip_gen: v5e
topology: v5e:2x2
jax: 0.10.0
libtpu: 0.0.40
codegen_flags: <defaults>
</compile_context>

<pallas_src>
import functools
import math

import jax
import jax.numpy as jnp
import numpy as np
from jax.experimental import pallas as pl
from jax.experimental.pallas import tpu as pltpu


def _split_channels(channels, num_groups):
    split = [channels // num_groups for _ in range(num_groups)]
    split[0] += channels - sum(split)
    return split


def _dw_conv_kernel(x_ref, w_ref, o_ref, xpad_ref, *, K, stride, Ho, Wo, p, wpad):
    """Depthwise conv on a channels-last (lane-dense) tile.

    x_ref   : (1, H, W, Ct)             input tile, channels in the 128-lane dim
    w_ref   : (K*K, Ct)                 taps, lane-dense in C (tap t = kh*K + kw)
    o_ref   : (1, Ho, Wo, Ct)           strided output tile
    xpad_ref: (H + 2p, W + 2*wpad, Ct)  VMEM scratch with the zero halo
                                        (wpad: sublane-aligned pad >= p)
    """
    H = x_ref.shape[1]
    W = x_ref.shape[2]
    Ct = x_ref.shape[3]
    Hs = H + 2 * p
    Ws = W + 2 * wpad
    dt = xpad_ref.dtype

    # Build the zero halo in VMEM (no HBM jnp.pad pass). Only the halo strips are
    # zeroed; the interior copy lands at a sublane-aligned column offset (wpad is a
    # multiple of 8) so every store below is aligned.
    if p > 0:
        xpad_ref[0:p, :, :] = jnp.zeros((p, Ws, Ct), dt)
        xpad_ref[p + H:Hs, :, :] = jnp.zeros((p, Ws, Ct), dt)
    if wpad > 0:
        xpad_ref[:, 0:wpad, :] = jnp.zeros((Hs, wpad, Ct), dt)
        xpad_ref[:, wpad + W:Ws, :] = jnp.zeros((Hs, wpad, Ct), dt)
    xpad_ref[p:p + H, wpad:wpad + W, :] = x_ref[0]

    woff = wpad - p  # column shift vs. the conventional p-padded coordinate frame

    # f32 accumulator; per-tap loads from the scratch ref keep live vreg state to
    # roughly one patch + the accumulator.
    acc = jnp.zeros((Ho, Wo, Ct), jnp.float32)
    for kh in range(K):               # static unroll over the K*K taps (VPU MACs)
        for kw in range(K):
            c0 = kw + woff
            if stride == 1:
                patch = xpad_ref[kh:kh + Ho, c0:c0 + Wo, :]
            else:
                # in-kernel stride: compute only the strided output rows/cols
                patch = xpad_ref[pl.ds(kh, Ho, stride), pl.ds(c0, Wo, stride), :]
            tap = w_ref[kh * K + kw:kh * K + kw + 1, :]       # (1, Ct) lane broadcast
            # product in the input dtype (bf16-friendly on v6e/v7x), accumulate in f32
            acc = acc + patch * tap
    o_ref[0] = acc.astype(o_ref.dtype)


def _depthwise_conv_group(x_nhwc, c_off, c_cnt, w_kkc, kernel_size, stride):
    """One channel-group's depthwise conv (padding = K // 2, no bias), NHWC in/out."""
    N, H, W, C = x_nhwc.shape
    K = kernel_size
    p = K // 2
    Ho = (H + 2 * p - K) // stride + 1
    Wo = (W + 2 * p - K) // stride + 1
    wpad = ((p + 7) // 8) * 8          # sublane-aligned halo width for the scratch

    w_kkc = w_kkc.astype(x_nhwc.dtype)

    # Channel tile = the lane dim of every block: full group when it satisfies the
    # (8,128) rule, else 128-lane tiles (extra grid points -> megacore parallelism).
    ct = c_cnt if c_cnt <= 128 else 128
    n_cb = pl.cdiv(c_cnt, ct)

    # When the tile is 128-aligned with the group's offset, read this group's channels
    # straight out of the shared NHWC activation via the index_map (no split/slice HBM
    # pass).  Otherwise slice just this group's lanes.
    if ct % 128 == 0 and c_off % ct == 0 and c_cnt % ct == 0:
        x_op, cb_off = x_nhwc, c_off // ct
    else:
        x_op = jax.lax.slice_in_dim(x_nhwc, c_off, c_off + c_cnt, axis=3)
        cb_off = 0

    itemsize = jnp.dtype(x_nhwc.dtype).itemsize
    block_bytes = (H * W + Ho * Wo + K * K) * ct * itemsize
    scratch_bytes = (H + 2 * p) * (W + 2 * wpad) * ct * itemsize
    # Explicit scoped-VMEM budget with headroom, capped at v7x's 64 MiB physical VMEM.
    vmem_limit = int(min(64 * 2 ** 20,
                         max(32 * 2 ** 20, (2 * block_bytes + scratch_bytes) * 5 // 4)))

    cost = pl.CostEstimate(
        flops=2 * N * c_cnt * Ho * Wo * K * K,
        transcendentals=0,
        bytes_accessed=(N * c_cnt * (H * W + Ho * Wo) + K * K * c_cnt) * itemsize,
    )

    kernel = functools.partial(_dw_conv_kernel, K=K, stride=stride,
                               Ho=Ho, Wo=Wo, p=p, wpad=wpad)
    return pl.pallas_call(
        kernel,
        out_shape=jax.ShapeDtypeStruct((N, Ho, Wo, c_cnt), x_nhwc.dtype),
        grid=(N, n_cb),
        in_specs=[
            pl.BlockSpec((1, H, W, ct), lambda n, c: (n, 0, 0, c + cb_off)),
            pl.BlockSpec((K * K, ct), lambda n, c: (0, c)),
        ],
        out_specs=pl.BlockSpec((1, Ho, Wo, ct), lambda n, c: (n, 0, 0, c)),
        scratch_shapes=[pltpu.VMEM((H + 2 * p, W + 2 * wpad, ct), x_nhwc.dtype)],
        compiler_params=pltpu.CompilerParams(
            dimension_semantics=("parallel", "parallel"),
            vmem_limit_bytes=vmem_limit,
        ),
        cost_estimate=cost,
    )(x_op, w_kkc)


class MDConv:
    """JAX/Pallas port of the PyTorch MDConv module (NCHW in / NCHW out)."""

    def __init__(self, channels, kernel_size, stride, key):
        self.num_groups = len(kernel_size)
        self.split_channels = _split_channels(channels, self.num_groups)
        self.kernel_size = list(kernel_size)
        self.stride = stride
        # Weights kept lane-dense as (K*K, Cg): row t = kh*K + kw holds the per-channel
        # tap values, broadcasting directly against NHWC patches in the kernel.
        self.weights = []
        for c, k in zip(self.split_channels, self.kernel_size):
            key, sub = jax.random.split(key)
            # Conv2d default init: U(-1/sqrt(fan_in), 1/sqrt(fan_in)); depthwise fan_in = k*k.
            bound = 1.0 / math.sqrt(k * k)
            self.weights.append(
                jax.random.uniform(sub, (k * k, c), jnp.float32, -bound, bound))

    def __call__(self, x):
        # x is NCHW (PyTorch layout); the kernel runs channels-last so C sits in the
        # lane dim.  Transposes are one-time layout plumbing shared by all groups.
        x_nhwc = jnp.transpose(x, (0, 2, 3, 1))
        outs = []
        off = 0
        for g in range(self.num_groups):
            outs.append(_depthwise_conv_group(
                x_nhwc, off, self.split_channels[g], self.weights[g],
                self.kernel_size[g], self.stride))
            off += self.split_channels[g]
        y = outs[0] if self.num_groups == 1 else jnp.concatenate(outs, axis=-1)
        return jnp.transpose(y, (0, 3, 1, 2))


def _reference(mdconv, x):
    """Pure-JAX reference via lax.conv_general_dilated (depthwise with feature_group_count)."""
    outs = []
    off = 0
    for w_kkc, k, c in zip(mdconv.weights, mdconv.kernel_size, mdconv.split_channels):
        t = x[:, off:off + c]
        off += c
        kern = jnp.transpose(w_kkc, (1, 0)).reshape(c, 1, k, k)   # OIHW with I = 1
        y = jax.lax.conv_general_dilated(
            t, kern,
            window_strides=(mdconv.stride, mdconv.stride),
            padding=[(k // 2, k // 2), (k // 2, k // 2)],
            dimension_numbers=("NCHW", "OIHW", "NCHW"),
            feature_group_count=c,
        )
        outs.append(y)
    return outs[0] if len(outs) == 1 else jnp.concatenate(outs, axis=1)


if __name__ == "__main__":
    key = jax.random.PRNGKey(0)
    k_x, k_w1, k_w2 = jax.random.split(key, 3)

    # Small shapes: batch=2, channels=4, spatial=16, kernel sizes [3, 5].
    N, C, H, W = 2, 4, 16, 16
    x = jax.random.normal(k_x, (N, C, H, W), jnp.float32)

    # stride = 1
    md1 = MDConv(channels=C, kernel_size=[3, 5], stride=1, key=k_w1)
    out1 = jax.block_until_ready(md1(x))
    ref1 = jax.block_until_ready(_reference(md1, x))
    np.testing.assert_allclose(np.asarray(out1), np.asarray(ref1), rtol=1e-5, atol=1e-5)
    assert out1.shape == (N, C, H, W)

    # stride = 2 (exercises the in-kernel strided-tap path)
    md2 = MDConv(channels=C, kernel_size=[3, 5], stride=2, key=k_w2)
    out2 = jax.block_until_ready(md2(x))
    ref2 = jax.block_until_ready(_reference(md2, x))
    np.testing.assert_allclose(np.asarray(out2), np.asarray(ref2), rtol=1e-5, atol=1e-5)
    assert out2.shape == (N, C, H // 2, W // 2)

    print("KERNEL_OK")
</pallas_src>

<mosaic_0001>
module attributes {stable_mosaic.version = 11 : i64} {
  func.func @_dw_conv_kernel(%arg0: i32, %arg1: i32, %arg2: memref<1x16x16x2xf32, #tpu.memory_space<vmem>>, %arg3: memref<9x2xf32, #tpu.memory_space<vmem>>, %arg4: memref<1x16x16x2xf32, #tpu.memory_space<vmem>>, %arg5: memref<18x32x2xf32, #tpu.memory_space<vmem>>) attributes {dimension_semantics = [#tpu.dimension_semantics<parallel>, #tpu.dimension_semantics<parallel>], iteration_bounds = array<i64: 2, 1>, scalar_prefetch = 0 : i64, scratch_operands = 1 : i64, tpu.core_type = #tpu.core_type<tc>, window_params = [{transform_indices = @transform_0, window_bounds = array<i64: 1, 16, 16, 2>}, {transform_indices = @transform_1, window_bounds = array<i64: 9, 2>}, {transform_indices = @transform_2, window_bounds = array<i64: 1, 16, 16, 2>}]} {
    %cst = arith.constant 0.000000e+00 : f32
    %0 = vector.broadcast %cst : f32 to vector<1x32x2xf32>
    %c0 = arith.constant 0 : index
    %c0_0 = arith.constant 0 : index
    %c0_1 = arith.constant 0 : index
    %1 = vector.load %arg5[%c0, %c0_0, %c0_1] : memref<18x32x2xf32, #tpu.memory_space<vmem>>, vector<1x32x2xf32>
    tpu.vector_store %arg5[%c0, %c0_0, %c0_1], %0 {strides = array<i32>} : memref<18x32x2xf32, #tpu.memory_space<vmem>>, vector<1x32x2xf32>,
    %cst_2 = arith.constant 0.000000e+00 : f32
    %2 = vector.broadcast %cst_2 : f32 to vector<1x32x2xf32>
    %c17 = arith.constant 17 : index
    %c0_3 = arith.constant 0 : index
    %c0_4 = arith.constant 0 : index
    %3 = vector.load %arg5[%c17, %c0_3, %c0_4] : memref<18x32x2xf32, #tpu.memory_space<vmem>>, vector<1x32x2xf32>
    tpu.vector_store %arg5[%c17, %c0_3, %c0_4], %2 {strides = array<i32>} : memref<18x32x2xf32, #tpu.memory_space<vmem>>, vector<1x32x2xf32>,
    %cst_5 = arith.constant 0.000000e+00 : f32
    %4 = vector.broadcast %cst_5 : f32 to vector<18x8x2xf32>
    %c0_6 = arith.constant 0 : index
    %c0_7 = arith.constant 0 : index
    %c0_8 = arith.constant 0 : index
    %5 = vector.load %arg5[%c0_6, %c0_7, %c0_8] : memref<18x32x2xf32, #tpu.memory_space<vmem>>, vector<18x8x2xf32>
    tpu.vector_store %arg5[%c0_6, %c0_7, %c0_8], %4 {strides = array<i32>} : memref<18x32x2xf32, #tpu.memory_space<vmem>>, vector<18x8x2xf32>,
    %cst_9 = arith.constant 0.000000e+00 : f32
    %6 = vector.broadcast %cst_9 : f32 to vector<18x8x2xf32>
    %c0_10 = arith.constant 0 : index
    %c24 = arith.constant 24 : index
    %c0_11 = arith.constant 0 : index
    %7 = vector.load %arg5[%c0_10, %c24, %c0_11] : memref<18x32x2xf32, #tpu.memory_space<vmem>>, vector<18x8x2xf32>
    tpu.vector_store %arg5[%c0_10, %c24, %c0_11], %6 {strides = array<i32>} : memref<18x32x2xf32, #tpu.memory_space<vmem>>, vector<18x8x2xf32>,
    %c0_12 = arith.constant 0 : index
    %c0_13 = arith.constant 0 : index
    %c0_14 = arith.constant 0 : index
    %c0_15 = arith.constant 0 : index
    %8 = vector.load %arg2[%c0_12, %c0_13, %c0_14, %c0_15] : memref<1x16x16x2xf32, #tpu.memory_space<vmem>>, vector<1x16x16x2xf32>
    %9 = vector.shape_cast %8 : vector<1x16x16x2xf32> to vector<16x16x2xf32>
    %c1 = arith.constant 1 : index
    %c8 = arith.constant 8 : index
    %c0_16 = arith.constant 0 : index
    %10 = vector.load %arg5[%c1, %c8, %c0_16] : memref<18x32x2xf32, #tpu.memory_space<vmem>>, vector<16x16x2xf32>
    tpu.vector_store %arg5[%c1, %c8, %c0_16], %9 {strides = array<i32>} : memref<18x32x2xf32, #tpu.memory_space<vmem>>, vector<16x16x2xf32>,
    %cst_17 = arith.constant 0.000000e+00 : f32
    %11 = vector.broadcast %cst_17 : f32 to vector<16x16x2xf32>
    %c0_18 = arith.constant 0 : index
    %c7 = arith.constant 7 : index
    %c0_19 = arith.constant 0 : index
    %12 = vector.load %arg5[%c0_18, %c7, %c0_19] : memref<18x32x2xf32, #tpu.memory_space<vmem>>, vector<16x16x2xf32>
    %c0_20 = arith.constant 0 : index
    %c0_21 = arith.constant 0 : index
    %13 = vector.load %arg3[%c0_20, %c0_21] : memref<9x2xf32, #tpu.memory_space<vmem>>, vector<1x2xf32>
    %14 = vector.shape_cast %13 : vector<1x2xf32> to vector<1x1x2xf32>
    %15 = vector.broadcast %14 : vector<1x1x2xf32> to vector<16x16x2xf32>
    %16 = arith.mulf %12, %15 : vector<16x16x2xf32>
    %17 = arith.addf %11, %16 : vector<16x16x2xf32>
    %c0_22 = arith.constant 0 : index
    %c8_23 = arith.constant 8 : index
    %c0_24 = arith.constant 0 : index
    %18 = vector.load %arg5[%c0_22, %c8_23, %c0_24] : memref<18x32x2xf32, #tpu.memory_space<vmem>>, vector<16x16x2xf32>
    %c1_25 = arith.constant 1 : index
    %c0_26 = arith.constant 0 : index
    %19 = vector.load %arg3[%c1_25, %c0_26] : memref<9x2xf32, #tpu.memory_space<vmem>>, vector<1x2xf32>
    %20 = vector.shape_cast %19 : vector<1x2xf32> to vector<1x1x2xf32>
    %21 = vector.broadcast %20 : vector<1x1x2xf32> to vector<16x16x2xf32>
    %22 = arith.mulf %18, %21 : vector<16x16x2xf32>
    %23 = arith.addf %17, %22 : vector<16x16x2xf32>
    %c0_27 = arith.constant 0 : index
    %c9 = arith.constant 9 : index
    %c0_28 = arith.constant 0 : index
    %24 = vector.load %arg5[%c0_27, %c9, %c0_28] : memref<18x32x2xf32, #tpu.memory_space<vmem>>, vector<16x16x2xf32>
    %c2 = arith.constant 2 : index
    %c0_29 = arith.constant 0 : index
    %25 = vector.load %arg3[%c2, %c0_29] : memref<9x2xf32, #tpu.memory_space<vmem>>, vector<1x2xf32>
    %26 = vector.shape_cast %25 : vector<1x2xf32> to vector<1x1x2xf32>
    %27 = vector.broadcast %26 : vector<1x1x2xf32> to vector<16x16x2xf32>
    %28 = arith.mulf %24, %27 : vector<16x16x2xf32>
    %29 = arith.addf %23, %28 : vector<16x16x2xf32>
    %c1_30 = arith.constant 1 : index
    %c7_31 = arith.constant 7 : index
    %c0_32 = arith.constant 0 : index
    %30 = vector.load %arg5[%c1_30, %c7_31, %c0_32] : memref<18x32x2xf32, #tpu.memory_space<vmem>>, vector<16x16x2xf32>
    %c3 = arith.constant 3 : index
    %c0_33 = arith.constant 0 : index
    %31 = vector.load %arg3[%c3, %c0_33] : memref<9x2xf32, #tpu.memory_space<vmem>>, vector<1x2xf32>
    %32 = vector.shape_cast %31 : vector<1x2xf32> to vector<1x1x2xf32>
    %33 = vector.broadcast %32 : vector<1x1x2xf32> to vector<16x16x2xf32>
    %34 = arith.mulf %30, %33 : vector<16x16x2xf32>
    %35 = arith.addf %29, %34 : vector<16x16x2xf32>
    %c1_34 = arith.constant 1 : index
    %c8_35 = arith.constant 8 : index
    %c0_36 = arith.constant 0 : index
    %36 = vector.load %arg5[%c1_34, %c8_35, %c0_36] : memref<18x32x2xf32, #tpu.memory_space<vmem>>, vector<16x16x2xf32>
    %c4 = arith.constant 4 : index
    %c0_37 = arith.constant 0 : index
    %37 = vector.load %arg3[%c4, %c0_37] : memref<9x2xf32, #tpu.memory_space<vmem>>, vector<1x2xf32>
    %38 = vector.shape_cast %37 : vector<1x2xf32> to vector<1x1x2xf32>
    %39 = vector.broadcast %38 : vector<1x1x2xf32> to vector<16x16x2xf32>
    %40 = arith.mulf %36, %39 : vector<16x16x2xf32>
    %41 = arith.addf %35, %40 : vector<16x16x2xf32>
    %c1_38 = arith.constant 1 : index
    %c9_39 = arith.constant 9 : index
    %c0_40 = arith.constant 0 : index
    %42 = vector.load %arg5[%c1_38, %c9_39, %c0_40] : memref<18x32x2xf32, #tpu.memory_space<vmem>>, vector<16x16x2xf32>
    %c5 = arith.constant 5 : index
    %c0_41 = arith.constant 0 : index
    %43 = vector.load %arg3[%c5, %c0_41] : memref<9x2xf32, #tpu.memory_space<vmem>>, vector<1x2xf32>
    %44 = vector.shape_cast %43 : vector<1x2xf32> to vector<1x1x2xf32>
    %45 = vector.broadcast %44 : vector<1x1x2xf32> to vector<16x16x2xf32>
    %46 = arith.mulf %42, %45 : vector<16x16x2xf32>
    %47 = arith.addf %41, %46 : vector<16x16x2xf32>
    %c2_42 = arith.constant 2 : index
    %c7_43 = arith.constant 7 : index
    %c0_44 = arith.constant 0 : index
    %48 = vector.load %arg5[%c2_42, %c7_43, %c0_44] : memref<18x32x2xf32, #tpu.memory_space<vmem>>, vector<16x16x2xf32>
    %c6 = arith.constant 6 : index
    %c0_45 = arith.constant 0 : index
    %49 = vector.load %arg3[%c6, %c0_45] : memref<9x2xf32, #tpu.memory_space<vmem>>, vector<1x2xf32>
    %50 = vector.shape_cast %49 : vector<1x2xf32> to vector<1x1x2xf32>
    %51 = vector.broadcast %50 : vector<1x1x2xf32> to vector<16x16x2xf32>
    %52 = arith.mulf %48, %51 : vector<16x16x2xf32>
    %53 = arith.addf %47, %52 : vector<16x16x2xf32>
    %c2_46 = arith.constant 2 : index
    %c8_47 = arith.constant 8 : index
    %c0_48 = arith.constant 0 : index
    %54 = vector.load %arg5[%c2_46, %c8_47, %c0_48] : memref<18x32x2xf32, #tpu.memory_space<vmem>>, vector<16x16x2xf32>
    %c7_49 = arith.constant 7 : index
    %c0_50 = arith.constant 0 : index
    %55 = vector.load %arg3[%c7_49, %c0_50] : memref<9x2xf32, #tpu.memory_space<vmem>>, vector<1x2xf32>
    %56 = vector.shape_cast %55 : vector<1x2xf32> to vector<1x1x2xf32>
    %57 = vector.broadcast %56 : vector<1x1x2xf32> to vector<16x16x2xf32>
    %58 = arith.mulf %54, %57 : vector<16x16x2xf32>
    %59 = arith.addf %53, %58 : vector<16x16x2xf32>
    %c2_51 = arith.constant 2 : index
    %c9_52 = arith.constant 9 : index
    %c0_53 = arith.constant 0 : index
    %60 = vector.load %arg5[%c2_51, %c9_52, %c0_53] : memref<18x32x2xf32, #tpu.memory_space<vmem>>, vector<16x16x2xf32>
    %c8_54 = arith.constant 8 : index
    %c0_55 = arith.constant 0 : index
    %61 = vector.load %arg3[%c8_54, %c0_55] : memref<9x2xf32, #tpu.memory_space<vmem>>, vector<1x2xf32>
    %62 = vector.shape_cast %61 : vector<1x2xf32> to vector<1x1x2xf32>
    %63 = vector.broadcast %62 : vector<1x1x2xf32> to vector<16x16x2xf32>
    %64 = arith.mulf %60, %63 : vector<16x16x2xf32>
    %65 = arith.addf %59, %64 : vector<16x16x2xf32>
    %c0_56 = arith.constant 0 : index
    %c0_57 = arith.constant 0 : index
    %c0_58 = arith.constant 0 : index
    %c0_59 = arith.constant 0 : index
    %66 = vector.load %arg4[%c0_56, %c0_57, %c0_58, %c0_59] : memref<1x16x16x2xf32, #tpu.memory_space<vmem>>, vector<1x16x16x2xf32>
    %67 = vector.shape_cast %66 : vector<1x16x16x2xf32> to vector<16x16x2xf32>
    %68 = vector.shape_cast %65 : vector<16x16x2xf32> to vector<1x16x16x2xf32>
    tpu.vector_store %arg4[%c0_56, %c0_57, %c0_58, %c0_59], %68 {strides = array<i32>} : memref<1x16x16x2xf32, #tpu.memory_space<vmem>>, vector<1x16x16x2xf32>,
    return
  }
  func.func @transform_0(%arg0: i32, %arg1: i32) -> (i32, i32, i32, i32) {
    %c0_i32 = arith.constant 0 : i32
    %0 = arith.addi %arg1, %c0_i32 : i32
    %c0_i32_0 = arith.constant 0 : i32
    %c0_i32_1 = arith.constant 0 : i32
    %c0_i32_2 = arith.constant 0 : i32
    return %arg0, %c0_i32_0, %c0_i32_1, %0 : i32, i32, i32, i32
  }
  func.func @transform_1(%arg0: i32, %arg1: i32) -> (i32, i32) {
    %c0_i32 = arith.constant 0 : i32
    %c0_i32_0 = arith.constant 0 : i32
    return %c0_i32, %arg1 : i32, i32
  }
  func.func @transform_2(%arg0: i32, %arg1: i32) -> (i32, i32, i32, i32) {
    %c0_i32 = arith.constant 0 : i32
    %c0_i32_0 = arith.constant 0 : i32
    %c0_i32_1 = arith.constant 0 : i32
    return %arg0, %c0_i32, %c0_i32_0, %arg1 : i32, i32, i32, i32
  }
}

</mosaic_0001>

<bundles_post_ra>
// kernel: tpu_custom_call.1
= control target key start
LH: loop header
LB: loop body
LE: loop exit
PB: predicated region body
PF: predicated region fallthrough
CT: control target
= control target key end

     0   :  { %s1414_s9 = smov 0   ;;  %s1416_s10 = smov 0   ;;  %s2142_s0 = inlined_call_operand.vmem [shape: f32[2,16,16,2], index: 0, kind: input, shape index: {}]   ;;  %s2143_s1 = inlined_call_operand.vmem [shape: f32[9,2], index: 1, kind: input, shape index: {}]   ;;  %s2144_s2 = inlined_call_operand.vmem [shape: f32[2,16,16,2], index: 2, kind: output, shape index: {}]  }
   0x1   :  { %s1418_s11 = smov 0  }
   0x2 LB: > { %s24_s12 = sadd.s32 1, %s1392_s10  ;;  %p1322_p0 = scmp.ge.s32.totalorder %s1396_s11, 1  ;;  %s1396_s11 = sphi %s1418_s11, %s12_s11   ;;  %s1392_s10 = sphi %s1416_s10, %s2146_s10   ;;  %s1388_s9 = sphi %s1414_s9, %s2145_s9  }
   0x3   : > { %p26_p1 = scmp.ge.s32.totalorder %s24_s12, 2  ;;  %p140_p2 = scmp.lt.s32.totalorder %s1396_s11, 3 }
   0x5   : > { %s2148_s12 = smov (%p26_p1, %s24_s12), 0  ;;  %p141_p3 = pnand %p1322_p0, %p140_p2 }
   0x6   : > { %p172_p4 = scmp.lt.s32.totalorder (!%p141_p3), %s1388_s9, 1 }
   0x7   : > { %144 = sbr.rel (%p141_p3) target bundleno = 208 (0xd0), region = 28 }
   0xc   : > { %vm192_vm0 = vcmask 15360   ;;  %v1398_v0 = vmov 0.0   ;;  %s2150_s9 = smov (!%p172_p4, %s1388_s9), 1  ;;  %v1497_v6 = vld [vmem:[%s2143_s1] ss:$0 sm:$0xff] }
   0xd   : > { %193 = vst.msk [vmem:[#allocation2] sm:$0xff] %vm192_vm0, %v1398_v0  ;;  %s1329_s13 = sshll.u32 %s2150_s9, 8  ;;  %v1503_v8 = vld [vmem:[%s2143_s1 + $0x1] ss:$0 sm:$0xff]  ;;  %v1508_v10 = vld [vmem:[%s2143_s1 + $0x2] ss:$0 sm:$0xff] }
   0xe   : > { %194 = vst.msk [vmem:[#allocation2 + $0x8] sm:$0xff] %vm192_vm0, %v1398_v0  ;;  %s1483_s16 = scalar_lea.vmem %s2142_s0, %s1329_s13  ;;  %v1526_v23 = vld [vmem:[%s2143_s1 + $0x3] ss:$0 sm:$0xff]  ;;  %v1537_v31 = vld [vmem:[%s2143_s1 + $0x4] ss:$0 sm:$0xff]  ;;  %s1714_s14 = scalar_lea.vmem %s2144_s2, %s1329_s13 }
   0xf   : > { %195 = vst.msk [vmem:[#allocation2 + $0x10] sm:$0xff] %vm192_vm0, %v1398_v0  ;;  %v238_v1 = vld [vmem:[%s1483_s16] sm:$0xff]  ;;  %v239_v2 = vld [vmem:[%s1483_s16 + $0x8] sm:$0xff]  ;;  %v240_v3 = vld [vmem:[%s1483_s16 + $0x10] sm:$0xff] }
  0x10   : > { %196 = vst.msk [vmem:[#allocation2 + $0x18] sm:$0xff] %vm192_vm0, %v1398_v0  ;;  %v241_v4 = vld [vmem:[%s1483_s16 + $0x18] sm:$0xff]  ;;  %v242_v11 = vld [vmem:[%s1483_s16 + $0x20] sm:$0xff]  ;;  %v243_v14 = vld [vmem:[%s1483_s16 + $0x28] sm:$0xff] }
  0x11   : > { %198 = vst.msk [vmem:[#allocation2 + $0x220] sm:$0xff] %vm192_vm0, %v1398_v0  ;;  %v244_v19 = vld [vmem:[%s1483_s16 + $0x30] sm:$0xff]  ;;  %v245_v21 = vld [vmem:[%s1483_s16 + $0x38] sm:$0xff]  ;;  %v246_v24 = vld [vmem:[%s1483_s16 + $0x40] sm:$0xff] }
  0x12   : > { %199 = vst.msk [vmem:[#allocation2 + $0x228] sm:$0xff] %vm192_vm0, %v1398_v0  ;;  %v247_v25 = vld [vmem:[%s1483_s16 + $0x48] sm:$0xff]  ;;  %v248_v28 = vld [vmem:[%s1483_s16 + $0x50] sm:$0xff]  ;;  %v249_v29 = vld [vmem:[%s1483_s16 + $0x58] sm:$0xff] }
  0x13   : > { %200 = vst.msk [vmem:[#allocation2 + $0x230] sm:$0xff] %vm192_vm0, %v1398_v0  ;;  %v250_v33 = vld [vmem:[%s1483_s16 + $0x60] sm:$0xff]  ;;  %v251_v42 = vld [vmem:[%s1483_s16 + $0x68] sm:$0xff]  ;;  %v252_v52 = vld [vmem:[%s1483_s16 + $0x70] sm:$0xff] }
  0x14   : > { %201 = vst.msk [vmem:[#allocation2 + $0x238] sm:$0xff] %vm192_vm0, %v1398_v0  ;;  %v1547_v37 = vld [vmem:[%s2143_s1 + $0x5] ss:$0 sm:$0xff]  ;;  %v1555_v44 = vld [vmem:[%s2143_s1 + $0x6] ss:$0 sm:$0xff]  ;;  %v253_v56 = vld [vmem:[%s1483_s16 + $0x78] sm:$0xff] }
  0x15   : > { %202 = vst.msk [vmem:[#allocation2] sm:$0xff] %vm192_vm0, %v1398_v0  ;;  %v401_v7 = vld [vmem:[#allocation2 + $0x8] sm:$0xff]  ;;  %v1566_v50 = vld [vmem:[%s2143_s1 + $0x7] ss:$0 sm:$0xff] }
  0x16   : > { %203 = vst.msk [vmem:[#allocation2 + $0x20] sm:$0xff] %vm192_vm0, %v1398_v0  ;;  %v499_v9 = vld [vmem:[#allocation2 + $0x9] sm:$0xff]  ;;  %v435_v15 = vmul.f32 %v1503_v8, %v401_v7  ;;  %v1579_v59 = vld [vmem:[%s2143_s1 + $0x8] ss:$0 sm:$0xff]  ;;  %v254_v63 = vld [vmem:[%s1483_s16 + $0x80] sm:$0xff] }
  0x17   : > { %204 = vst.msk [vmem:[#allocation2 + $0x40] sm:$0xff] %vm192_vm0, %v1398_v0  ;;  %v304_v13 = vld [vmem:[#allocation2 + $0xf] sm:$0xff]  ;;  %v533_v16 = vmul.f32 %v1508_v10, %v499_v9 }
  0x18   : > { %205 = vst.msk [vmem:[#allocation2 + $0x60] sm:$0xff] %vm192_vm0, %v1398_v0  ;;  %v338_v17 = vmul.f32 %v1497_v6, %v304_v13  ;;  %v402_v18 = vld [vmem:[#allocation2 + $0x10] sm:$0xff] }
  0x19   : > { %206 = vst.msk [vmem:[#allocation2 + $0x80] sm:$0xff] %vm192_vm0, %v1398_v0  ;;  %v436_v20 = vmul.f32 %v1503_v8, %v402_v18  ;;  %v256_v13 = vld [vmem:[%s1483_s16 + $0x90] sm:$0xff] }
  0x1a   : > { %207 = vst.msk [vmem:[#allocation2 + $0xa0] sm:$0xff] %vm192_vm0, %v1398_v0 }
  0x1b   : > { %208 = vst.msk [vmem:[#allocation2 + $0xc0] sm:$0xff] %vm192_vm0, %v1398_v0  ;;  %v468_v26 = vadd.f32 %v436_v20, %v338_v17  ;;  %v257_v20 = vld [vmem:[%s1483_s16 + $0x98] sm:$0xff] }
  0x1c   : > { %209 = vst.msk [vmem:[#allocation2 + $0xe0] sm:$0xff] %vm192_vm0, %v1398_v0  ;;  %v303_v5 = vld [vmem:[#allocation2 + $0x7] sm:$0xff] }
  0x1d   : > { %210 = vst.msk [vmem:[#allocation2 + $0x100] sm:$0xff] %vm192_vm0, %v1398_v0  ;;  %v337_v12 = vmul.f32 %v1497_v6, %v303_v5 }
  0x1e   : > { %211 = vst.msk [vmem:[#allocation2 + $0x120] sm:$0xff] %vm192_vm0, %v1398_v0 }
  0x1f   : > { %212 = vst.msk [vmem:[#allocation2 + $0x140] sm:$0xff] %vm192_vm0, %v1398_v0  ;;  %v467_v22 = vadd.f32 %v435_v15, %v337_v12 }
  0x20   : > { %213 = vst.msk [vmem:[#allocation2 + $0x160] sm:$0xff] %vm192_vm0, %v1398_v0 }
  0x21   : > { %214 = vst.msk [vmem:[#allocation2 + $0x180] sm:$0xff] %vm192_vm0, %v1398_v0  ;;  %v565_v30 = vadd.f32 %v533_v16, %v467_v22 }
  0x22   : > { %215 = vst.msk [vmem:[#allocation2 + $0x1a0] sm:$0xff] %vm192_vm0, %v1398_v0 }
  0x23   : > { %216 = vst.msk [vmem:[#allocation2 + $0x1c0] sm:$0xff] %vm192_vm0, %v1398_v0 }
  0x24   : > { %217 = vst.msk [vmem:[#allocation2 + $0x1e0] sm:$0xff] %vm192_vm0, %v1398_v0 }
  0x25   : > { %218 = vst.msk [vmem:[#allocation2 + $0x200] sm:$0xff] %vm192_vm0, %v1398_v0 }
  0x26   : > { %221 = vst.msk [vmem:[#allocation2 + $0x38] sm:$0xff] %vm192_vm0, %v1398_v0 }
  0x27   : > { %222 = vst.msk [vmem:[#allocation2 + $0x58] sm:$0xff] %vm192_vm0, %v1398_v0 }
  0x28   : > { %223 = vst.msk [vmem:[#allocation2 + $0x78] sm:$0xff] %vm192_vm0, %v1398_v0 }
  0x29   : > { %224 = vst.msk [vmem:[#allocation2 + $0x98] sm:$0xff] %vm192_vm0, %v1398_v0 }
  0x2a   : > { %225 = vst.msk [vmem:[#allocation2 + $0xb8] sm:$0xff] %vm192_vm0, %v1398_v0 }
  0x2b   : > { %226 = vst.msk [vmem:[#allocation2 + $0xd8] sm:$0xff] %vm192_vm0, %v1398_v0 }
  0x2c   : > { %227 = vst.msk [vmem:[#allocation2 + $0xf8] sm:$0xff] %vm192_vm0, %v1398_v0 }
  0x2d   : > { %228 = vst.msk [vmem:[#allocation2 + $0x118] sm:$0xff] %vm192_vm0, %v1398_v0 }
  0x2e   : > { %229 = vst.msk [vmem:[#allocation2 + $0x138] sm:$0xff] %vm192_vm0, %v1398_v0 }
  0x2f   : > { %230 = vst.msk [vmem:[#allocation2 + $0x158] sm:$0xff] %vm192_vm0, %v1398_v0 }
  0x30   : > { %231 = vst.msk [vmem:[#allocation2 + $0x178] sm:$0xff] %vm192_vm0, %v1398_v0 }
  0x31   : > { %232 = vst.msk [vmem:[#allocation2 + $0x198] sm:$0xff] %vm192_vm0, %v1398_v0 }
  0x32   : > { %233 = vst.msk [vmem:[#allocation2 + $0x1b8] sm:$0xff] %vm192_vm0, %v1398_v0 }
  0x33   : > { %234 = vst.msk [vmem:[#allocation2 + $0x1d8] sm:$0xff] %vm192_vm0, %v1398_v0 }
  0x34   : > { %235 = vst.msk [vmem:[#allocation2 + $0x1f8] sm:$0xff] %vm192_vm0, %v1398_v0 }
  0x35   : > { %236 = vst.msk [vmem:[#allocation2 + $0x218] sm:$0xff] %vm192_vm0, %v1398_v0 }
  0x36   : > { %219 = vst.msk [vmem:[#allocation2 + $0x220] sm:$0xff] %vm192_vm0, %v1398_v0 }
  0x37   : > { %220 = vst.msk [vmem:[#allocation2 + $0x18] sm:$0xff] %vm192_vm0, %v1398_v0 }
  0x38   : > { %237 = vst.msk [vmem:[#allocation2 + $0x238] sm:$0xff] %vm192_vm0, %v1398_v0 }
  0x39   : > { %271 = vst.msk [vmem:[#allocation2 + $0x28] sm:$0xff] %vm192_vm0, %v238_v1 }
  0x3a   : > { %272 = vst.msk [vmem:[#allocation2 + $0x30] sm:$0xff] %vm192_vm0, %v239_v2 }
  0x3b   : > { %273 = vst.msk [vmem:[#allocation2 + $0x48] sm:$0xff] %vm192_vm0, %v240_v3 }
  0x3c   : > { %274 = vst.msk [vmem:[#allocation2 + $0x50] sm:$0xff] %vm192_vm0, %v241_v4  ;;  %v255_v4 = vld [vmem:[%s1483_s16 + $0x88] sm:$0xff] }
  0x3d   : > { %275 = vst.msk [vmem:[#allocation2 + $0x68] sm:$0xff] %vm192_vm0, %v242_v11 }
  0x3e   : > { %276 = vst.msk [vmem:[#allocation2 + $0x70] sm:$0xff] %vm192_vm0, %v243_v14  ;;  %v500_v27 = vld [vmem:[#allocation2 + $0x11] sm:$0xff] }
  0x3f   : > { %277 = vst.msk [vmem:[#allocation2 + $0x88] sm:$0xff] %vm192_vm0, %v244_v19  ;;  %v534_v32 = vmul.f32 %v1508_v10, %v500_v27  ;;  %v258_v27 = vld [vmem:[%s1483_s16 + $0xa0] sm:$0xff] }
  0x40   : > { %278 = vst.msk [vmem:[#allocation2 + $0x90] sm:$0xff] %vm192_vm0, %v245_v21  ;;  %v597_v34 = vld [vmem:[#allocation2 + $0x27] sm:$0xff] }
  0x41   : > { %v695_v35 = vld [vmem:[#allocation2 + $0x28] sm:$0xff]  ;;  %279 = vst.msk [vmem:[#allocation2 + $0xa8] sm:$0xff] %vm192_vm0, %v246_v24  ;;  %v631_v36 = vmul.f32 %v1526_v23, %v597_v34  ;;  %v566_v38 = vadd.f32 %v534_v32, %v468_v26  ;;  %v696_v40 = vld [vmem:[#allocation2 + $0x30] sm:$0xff]  ;;  %v339_v41 = vmul.f32 %v1497_v6, %v597_v34 }
  0x42   : > { %v598_v39 = vld [vmem:[#allocation2 + $0x2f] sm:$0xff]  ;;  %280 = vst.msk [vmem:[#allocation2 + $0xb0] sm:$0xff] %vm192_vm0, %v247_v25  ;;  %v437_v46 = vmul.f32 %v1503_v8, %v695_v35  ;;  %v729_v48 = vmul.f32 %v1537_v31, %v695_v35  ;;  %v1561_v49 = vld [vmem:[#allocation2 + $0x47] sm:$0xff]  ;;  %v730_v55 = vmul.f32 %v1537_v31, %v696_v40  ;;  %v438_v19 = vmul.f32 %v1503_v8, %v696_v40 }
  0x43   : > { %v793_v43 = vld [vmem:[#allocation2 + $0x29] sm:$0xff]  ;;  %v632_v45 = vmul.f32 %v1526_v23, %v598_v39  ;;  %281 = vst.msk [vmem:[#allocation2 + $0xc8] sm:$0xff] %vm192_vm0, %v248_v28  ;;  %v663_v47 = vadd.f32 %v631_v36, %v565_v30  ;;  %v794_v51 = vld [vmem:[#allocation2 + $0x31] sm:$0xff]  ;;  %v926_v0 = vmul.f32 %v1555_v44, %v1561_v49  ;;  %v633_v12 = vmul.f32 %v1526_v23, %v1561_v49 }
  0x44   : > { %282 = vst.msk [vmem:[#allocation2 + $0xd0] sm:$0xff] %vm192_vm0, %v249_v29  ;;  %v1570_v53 = vld [vmem:[#allocation2 + $0x48] sm:$0xff]  ;;  %v827_v58 = vmul.f32 %v1547_v37, %v793_v43  ;;  %v469_v61 = vadd.f32 %v437_v46, %v339_v41  ;;  %v535_v62 = vmul.f32 %v1508_v10, %v793_v43  ;;  %v828_v3 = vmul.f32 %v1547_v37, %v794_v51  ;;  %v1595_v9 = vld [vmem:[#allocation2 + $0x50] sm:$0xff] }
  0x45   : > { %v664_v54 = vadd.f32 %v632_v45, %v566_v38  ;;  %283 = vst.msk [vmem:[#allocation2 + $0xe8] sm:$0xff] %vm192_vm0, %v250_v33  ;;  %v761_v57 = vadd.f32 %v729_v48, %v663_v47  ;;  %v1581_v60 = vld [vmem:[#allocation2 + $0x4f] sm:$0xff]  ;;  %v1024_v7 = vmul.f32 %v1566_v50, %v1570_v53  ;;  %v1605_v17 = vld [vmem:[#allocation2 + $0x67] sm:$0xff]  ;;  %v340_v18 = vmul.f32 %v1497_v6, %v598_v39  ;;  %v261_v47 = vld [vmem:[%s1483_s16 + $0xb8] sm:$0xff] }
  0x46   : > { %284 = vst.msk [vmem:[#allocation2 + $0xf0] sm:$0xff] %vm192_vm0, %v251_v42  ;;  %v1588_v1 = vld [vmem:[#allocation2 + $0x49] sm:$0xff]  ;;  %v567_v11 = vadd.f32 %v535_v62, %v469_v61  ;;  %v927_v15 = vmul.f32 %v1555_v44, %v1581_v60  ;;  %v1603_v16 = vld [vmem:[#allocation2 + $0x51] sm:$0xff]  ;;  %v731_v25 = vmul.f32 %v1537_v31, %v1570_v53  ;;  %v1025_v29 = vmul.f32 %v1566_v50, %v1595_v9 }
  0x47   : > { %v762_v2 = vadd.f32 %v730_v55, %v664_v54  ;;  %285 = vst.msk [vmem:[#allocation2 + $0x108] sm:$0xff] %vm192_vm0, %v252_v52  ;;  %v859_v5 = vadd.f32 %v827_v58, %v761_v57  ;;  %v1122_v22 = vmul.f32 %v1579_v59, %v1588_v1  ;;  %v1615_v26 = vld [vmem:[#allocation2 + $0x68] sm:$0xff]  ;;  %v470_v32 = vadd.f32 %v438_v19, %v340_v18  ;;  %v260_v40 = vld [vmem:[%s1483_s16 + $0xb0] sm:$0xff] }
  0x48   : > { %286 = vst.msk [vmem:[#allocation2 + $0x110] sm:$0xff] %vm192_vm0, %v253_v56  ;;  %v665_v24 = vadd.f32 %v633_v12, %v567_v11  ;;  %v1621_v30 = vld [vmem:[#allocation2 + $0x69] sm:$0xff]  ;;  %v536_v33 = vmul.f32 %v1508_v10, %v794_v51  ;;  %v1123_v35 = vmul.f32 %v1579_v59, %v1603_v16  ;;  %v829_v38 = vmul.f32 %v1547_v37, %v1588_v1  ;;  %v1648_v55 = vld [vmem:[#allocation2 + $0x71] sm:$0xff] }
  0x49   : > { %v860_v14 = vadd.f32 %v828_v3, %v762_v2  ;;  %287 = vst.msk [vmem:[#allocation2 + $0x128] sm:$0xff] %vm192_vm0, %v254_v63  ;;  %v958_v21 = vadd.f32 %v926_v0, %v859_v5  ;;  %v259_v34 = vld [vmem:[%s1483_s16 + $0xa8] sm:$0xff]  ;;  %v928_v39 = vmul.f32 %v1555_v44, %v1605_v17  ;;  %v1026_v41 = vmul.f32 %v1566_v50, %v1615_v26  ;;  %v1646_v54 = vld [vmem:[#allocation2 + $0x70] sm:$0xff] }
  0x4a   : > { %288 = vst.msk [vmem:[#allocation2 + $0x130] sm:$0xff] %vm192_vm0, %v255_v4  ;;  %v763_v36 = vadd.f32 %v731_v25, %v665_v24  ;;  %v568_v42 = vadd.f32 %v536_v33, %v470_v32  ;;  %v634_v43 = vmul.f32 %v1526_v23, %v1581_v60  ;;  %v1638_v45 = vld [vmem:[#allocation2 + $0x6f] sm:$0xff]  ;;  %v341_v46 = vmul.f32 %v1497_v6, %v1561_v49  ;;  %v262_v49 = vld [vmem:[%s1483_s16 + $0xc0] sm:$0xff] }
  0x4b   : > { %v959_v28 = vadd.f32 %v927_v15, %v860_v14  ;;  %289 = vst.msk [vmem:[#allocation2 + $0x148] sm:$0xff] %vm192_vm0, %v256_v13  ;;  %v1056_v48 = vadd.f32 %v1024_v7, %v958_v21  ;;  %v1124_v52 = vmul.f32 %v1579_v59, %v1621_v30  ;;  %v439_v56 = vmul.f32 %v1503_v8, %v1570_v53  ;;  %v263_v63 = vld [vmem:[%s1483_s16 + $0xc8] sm:$0xff]  ;;  %v264_v4 = vld [vmem:[%s1483_s16 + $0xd0] sm:$0xff]  ;;  %v265_v13 = vld [vmem:[%s1483_s16 + $0xd8] sm:$0xff] }
  0x4c   : > { %290 = vst.msk [vmem:[#allocation2 + $0x150] sm:$0xff] %vm192_vm0, %v257_v20  ;;  %v861_v51 = vadd.f32 %v829_v38, %v763_v36  ;;  %v666_v58 = vadd.f32 %v634_v43, %v568_v42  ;;  %v732_v61 = vmul.f32 %v1537_v31, %v1595_v9  ;;  %v830_v62 = vmul.f32 %v1547_v37, %v1603_v16  ;;  %v1676_v18 = vld [vmem:[#allocation2 + $0x87] sm:$0xff] }
  0x4d   : > { %291 = vst.msk [vmem:[#allocation2 + $0x168] sm:$0xff] %vm192_vm0, %v258_v27  ;;  %v1057_v57 = vadd.f32 %v1025_v29, %v959_v28  ;;  %v929_v2 = vmul.f32 %v1555_v44, %v1638_v45  ;;  %v471_v53 = vadd.f32 %v439_v56, %v341_v46  ;;  %v537_v3 = vmul.f32 %v1508_v10, %v1588_v1  ;;  %v1678_v19 = vld [vmem:[#allocation2 + $0x88] sm:$0xff] }
  0x4e   : > { %292 = vst.msk [vmem:[#allocation2 + $0x170] sm:$0xff] %vm192_vm0, %v259_v34  ;;  %v960_v0 = vadd.f32 %v928_v39, %v861_v51  ;;  %v764_v5 = vadd.f32 %v732_v61, %v666_v58  ;;  %v1027_v7 = vmul.f32 %v1566_v50, %v1646_v54  ;;  %v1125_v11 = vmul.f32 %v1579_v59, %v1648_v55  ;;  %v267_v27 = vld [vmem:[%s1483_s16 + $0xe8] sm:$0xff]  ;;  %v268_v34 = vld [vmem:[%s1483_s16 + $0xf0] sm:$0xff] }
  0x4f   : > { %293 = vst.msk [vmem:[#allocation2 + $0x188] sm:$0xff] %vm192_vm0, %v260_v40  ;;  %v342_v12 = vmul.f32 %v1497_v6, %v1581_v60  ;;  %v1154_v14 = vadd.f32 %v1122_v22, %v1056_v48  ;;  %v569_v1 = vadd.f32 %v537_v3, %v471_v53  ;;  %v635_v15 = vmul.f32 %v1526_v23, %v1605_v17  ;;  %v266_v60 = vld [vmem:[%s1483_s16 + $0xe0] sm:$0xff]  ;;  %v1690_v32 = vld [vmem:[#allocation2 + $0x89] sm:$0xff]  ;;  %v269_v40 = vld [vmem:[%s1483_s16 + $0xf8] sm:$0xff] }
  0x50   : > { %294 = vst.msk [vmem:[#allocation2 + $0x190] sm:$0xff] %vm192_vm0, %v261_v47  ;;  %v440_v20 = vmul.f32 %v1503_v8, %v1595_v9  ;;  %v1155_v21 = vadd.f32 %v1123_v35, %v1057_v57  ;;  %v1058_v24 = vadd.f32 %v1026_v41, %v960_v0  ;;  %v862_v25 = vadd.f32 %v830_v62, %v764_v5  ;;  %v897_v56 = vld [vmem:[#allocation2 + $0x8f] sm:$0xff] }
  0x51   : > { %295 = vst.msk [vmem:[#allocation2 + $0x1a8] sm:$0xff] %vm192_vm0, %v262_v49  ;;  %v733_v22 = vmul.f32 %v1537_v31, %v1615_v26  ;;  %v667_v28 = vadd.f32 %v635_v15, %v569_v1  ;;  %v831_v29 = vmul.f32 %v1547_v37, %v1621_v30  ;;  %v538_v33 = vmul.f32 %v1508_v10, %v1603_v16  ;;  %v995_v49 = vld [vmem:[#allocation2 + $0x90] sm:$0xff]  ;;  %v996_v1 = vld [vmem:[#allocation2 + $0xa8] sm:$0xff] }
  0x52   : > { %296 = vst.msk [vmem:[#allocation2 + $0x1b0] sm:$0xff] %vm192_vm0, %v263_v63  ;;  %v472_v9 = vadd.f32 %v440_v20, %v342_v12  ;;  %v961_v35 = vadd.f32 %v929_v2, %v862_v25  ;;  %v930_v36 = vmul.f32 %v1555_v44, %v1676_v18  ;;  %v1028_v38 = vmul.f32 %v1566_v50, %v1678_v19  ;;  %v1093_v53 = vld [vmem:[#allocation2 + $0x91] sm:$0xff] }
  0x53   : > { %297 = vst.msk [vmem:[#allocation2 + $0x1c8] sm:$0xff] %vm192_vm0, %v264_v4  ;;  %v343_v39 = vmul.f32 %v1497_v6, %v1605_v17  ;;  %v765_v41 = vadd.f32 %v733_v22, %v667_v28  ;;  %v636_v16 = vmul.f32 %v1526_v23, %v1638_v45  ;;  %v441_v43 = vmul.f32 %v1503_v8, %v1615_v26  ;;  %v899_v28 = vld [vmem:[#allocation2 + $0xaf] sm:$0xff] }
  0x54   : > { %298 = vst.msk [vmem:[#allocation2 + $0x1d0] sm:$0xff] %vm192_vm0, %v265_v13  ;;  %v570_v42 = vadd.f32 %v538_v33, %v472_v9  ;;  %v1156_v17 = vadd.f32 %v1124_v52, %v1058_v24  ;;  %v1059_v46 = vadd.f32 %v1027_v7, %v961_v35  ;;  %v1126_v47 = vmul.f32 %v1579_v59, %v1690_v32 }
  0x55   : > { %299 = vst.msk [vmem:[#allocation2 + $0x1e8] sm:$0xff] %vm192_vm0, %v266_v60  ;;  %v734_v48 = vmul.f32 %v1537_v31, %v1646_v54  ;;  %v863_v26 = vadd.f32 %v831_v29, %v765_v41  ;;  %v473_v57 = vadd.f32 %v441_v43, %v343_v39  ;;  %v539_v58 = vmul.f32 %v1508_v10, %v1621_v30  ;;  %v997_v39 = vld [vmem:[#allocation2 + $0xb0] sm:$0xff] }
  0x56   : > { %300 = vst.msk [vmem:[#allocation2 + $0x1f0] sm:$0xff] %vm192_vm0, %v267_v27  ;;  %v668_v51 = vadd.f32 %v636_v16, %v570_v42  ;;  %v1157_v52 = vadd.f32 %v1125_v11, %v1059_v46  ;;  %v832_v61 = vmul.f32 %v1547_v37, %v1648_v55  ;;  %v637_v62 = vmul.f32 %v1526_v23, %v1676_v18  ;;  %v1095_v42 = vld [vmem:[#allocation2 + $0xb1] sm:$0xff] }
  0x57   : > { %301 = vst.msk [vmem:[#allocation2 + $0x208] sm:$0xff] %vm192_vm0, %v268_v34  ;;  %v344_v63 = vmul.f32 %v1497_v6, %v1638_v45  ;;  %v962_v0 = vadd.f32 %v930_v36, %v863_v26  ;;  %v571_v30 = vadd.f32 %v539_v58, %v473_v57  ;;  %v442_v3 = vmul.f32 %v1503_v8, %v1646_v54  ;;  %v1744_v54 = vld [vmem:[#allocation2 + $0xa9] sm:$0xff] }
  0x58   : > { %302 = vst.msk [vmem:[#allocation2 + $0x210] sm:$0xff] %vm192_vm0, %v269_v40  ;;  %v766_v2 = vadd.f32 %v734_v48, %v668_v51  ;;  %v931_v4 = vmul.f32 %v1555_v44, %v897_v56  ;;  %v1029_v5 = vmul.f32 %v1566_v50, %v995_v49  ;;  %v735_v7 = vmul.f32 %v1537_v31, %v1678_v19  ;;  %v900_v57 = vld [vmem:[#allocation2 + $0xc7] sm:$0xff] }
  0x59   : > { %1186 = vst.msk [vmem:[%s1714_s14] sm:$0xff] %vm192_vm0, %v1154_v14  ;;  %v540_v45 = vmul.f32 %v1508_v10, %v1648_v55  ;;  %v1060_v11 = vadd.f32 %v1028_v38, %v962_v0  ;;  %v669_v13 = vadd.f32 %v637_v62, %v571_v30  ;;  %v898_v14 = vld [vmem:[#allocation2 + $0xa7] sm:$0xff]  ;;  %v474_v15 = vadd.f32 %v442_v3, %v344_v63 }
  0x5a   : > { %1187 = vst.msk [vmem:[%s1714_s14 + $0x8] sm:$0xff] %vm192_vm0, %v1155_v21  ;;  %v864_v12 = vadd.f32 %v832_v61, %v766_v2  ;;  %v1127_v20 = vmul.f32 %v1579_v59, %v1093_v53  ;;  %v833_v60 = vmul.f32 %v1547_v37, %v1690_v32  ;;  %v638_v55 = vmul.f32 %v1526_v23, %v897_v56  ;;  %v998_v0 = vld [vmem:[#allocation2 + $0xc8] sm:$0xff] }
  0x5b   : > { %1188 = vst.msk [vmem:[%s1714_s14 + $0x10] sm:$0xff] %vm192_vm0, %v1156_v17  ;;  %v345_v21 = vmul.f32 %v1497_v6, %v1676_v18  ;;  %v1158_v24 = vadd.f32 %v1126_v47, %v1060_v11  ;;  %v767_v22 = vadd.f32 %v735_v7, %v669_v13  ;;  %v572_v27 = vadd.f32 %v540_v45, %v474_v15  ;;  %v1777_v2 = vld [vmem:[#allocation2 + $0xc9] sm:$0xff] }
  0x5c   : > { %1189 = vst.msk [vmem:[%s1714_s14 + $0x18] sm:$0xff] %vm192_vm0, %v1157_v52  ;;  %v963_v25 = vadd.f32 %v931_v4, %v864_v12  ;;  %v932_v29 = vmul.f32 %v1555_v44, %v898_v14  ;;  %v1030_v9 = vmul.f32 %v1566_v50, %v996_v1  ;;  %v1128_v33 = vmul.f32 %v1579_v59, %v1744_v54 }
  0x5d   : > { %v443_v34 = vmul.f32 %v1503_v8, %v1678_v19  ;;  %1190 = vst.msk [vmem:[%s1714_s14 + $0x20] sm:$0xff] %vm192_vm0, %v1158_v24  ;;  %v865_v36 = vadd.f32 %v833_v60, %v767_v22  ;;  %v670_v18 = vadd.f32 %v638_v55, %v572_v27  ;;  %v736_v38 = vmul.f32 %v1537_v31, %v995_v49  ;;  %v999_v24 = vld [vmem:[#allocation2 + $0xd0] sm:$0xff] }
  0x5e   : > { %v1061_v35 = vadd.f32 %v1029_v5, %v963_v25  ;;  %v834_v40 = vmul.f32 %v1547_v37, %v1093_v53  ;;  %v933_v41 = vmul.f32 %v1555_v44, %v899_v28  ;;  %v541_v43 = vmul.f32 %v1508_v10, %v1690_v32 }
  0x5f   : > { %v475_v16 = vadd.f32 %v443_v34, %v345_v21  ;;  %v964_v19 = vadd.f32 %v932_v29, %v865_v36  ;;  %v768_v46 = vadd.f32 %v736_v38, %v670_v18  ;;  %v346_v47 = vmul.f32 %v1497_v6, %v897_v56 }
  0x60   : > { %v1159_v17 = vadd.f32 %v1127_v20, %v1061_v35  ;;  %v1031_v48 = vmul.f32 %v1566_v50, %v997_v39  ;;  %v639_v51 = vmul.f32 %v1526_v23, %v898_v14  ;;  %v444_v58 = vmul.f32 %v1503_v8, %v995_v49  ;;  %v1097_v35 = vld [vmem:[#allocation2 + $0xd1] sm:$0xff] }
  0x61   : > { %v573_v26 = vadd.f32 %v541_v43, %v475_v16  ;;  %v1062_v52 = vadd.f32 %v1030_v9, %v964_v19  ;;  %v866_v61 = vadd.f32 %v834_v40, %v768_v46  ;;  %v1129_v62 = vmul.f32 %v1579_v59, %v1095_v42  ;;  %v1000_v19 = vld [vmem:[#allocation2 + $0xe8] sm:$0xff] }
  0x62   : > { %1191 = vst.msk [vmem:[%s1714_s14 + $0x28] sm:$0xff] %vm192_vm0, %v1159_v17  ;;  %v737_v32 = vmul.f32 %v1537_v31, %v996_v1  ;;  %v835_v56 = vmul.f32 %v1547_v37, %v1744_v54  ;;  %v476_v30 = vadd.f32 %v444_v58, %v346_v47  ;;  %v542_v3 = vmul.f32 %v1508_v10, %v1093_v53  ;;  %v1802_v46 = vld [vmem:[#allocation2 + $0xe9] sm:$0xff] }
  0x63   : > { %v671_v63 = vadd.f32 %v639_v51, %v573_v26  ;;  %v1160_v49 = vadd.f32 %v1128_v33, %v1062_v52  ;;  %v965_v4 = vadd.f32 %v933_v41, %v866_v61  ;;  %v934_v5 = vmul.f32 %v1555_v44, %v900_v57 }
  0x64   : > { %v347_v7 = vmul.f32 %v1497_v6, %v898_v14  ;;  %v574_v11 = vadd.f32 %v542_v3, %v476_v30  ;;  %v640_v12 = vmul.f32 %v1526_v23, %v899_v28  ;;  %v445_v13 = vmul.f32 %v1503_v8, %v996_v1  ;;  %v901_v14 = vld [vmem:[#allocation2 + $0xcf] sm:$0xff] }
  0x65   : > { %v769_v45 = vadd.f32 %v737_v32, %v671_v63  ;;  %1192 = vst.msk [vmem:[%s1714_s14 + $0x30] sm:$0xff] %vm192_vm0, %v1160_v49  ;;  %v1063_v15 = vadd.f32 %v1031_v48, %v965_v4  ;;  %v1032_v20 = vmul.f32 %v1566_v50, %v998_v0  ;;  %v1130_v53 = vmul.f32 %v1579_v59, %v1777_v2 }
  0x66   : > { %v738_v60 = vmul.f32 %v1537_v31, %v997_v39  ;;  %v672_v21 = vadd.f32 %v640_v12, %v574_v11  ;;  %v477_v25 = vadd.f32 %v445_v13, %v347_v7  ;;  %v543_v22 = vmul.f32 %v1508_v10, %v1744_v54  ;;  %v1099_v11 = vld [vmem:[#allocation2 + $0xf1] sm:$0xff] }
  0x67   : > { %v867_v55 = vadd.f32 %v835_v56, %v769_v45  ;;  %v1161_v1 = vadd.f32 %v1129_v62, %v1063_v15  ;;  %v836_v27 = vmul.f32 %v1547_v37, %v1095_v42  ;;  %v641_v29 = vmul.f32 %v1526_v23, %v900_v57  ;;  %v903_v62 = vld [vmem:[#allocation2 + $0xef] sm:$0xff] }
  0x68   : > { %v348_v9 = vmul.f32 %v1497_v6, %v899_v28  ;;  %v770_v34 = vadd.f32 %v738_v60, %v672_v21  ;;  %v575_v36 = vadd.f32 %v543_v22, %v477_v25  ;;  %v446_v18 = vmul.f32 %v1503_v8, %v997_v39  ;;  %v902_v28 = vld [vmem:[#allocation2 + $0xe7] sm:$0xff] }
  0x69   : > { %v966_v33 = vadd.f32 %v934_v5, %v867_v55  ;;  %1193 = vst.msk [vmem:[%s1714_s14 + $0x38] sm:$0xff] %vm192_vm0, %v1161_v1  ;;  %v935_v38 = vmul.f32 %v1555_v44, %v901_v14  ;;  %v1033_v40 = vmul.f32 %v1566_v50, %v999_v24  ;;  %v739_v54 = vmul.f32 %v1537_v31, %v998_v0  ;;  %v1001_v5 = vld [vmem:[#allocation2 + $0xf0] sm:$0xff]  ;;  %v904_v25 = vld [vmem:[#allocation2 + $0x107] sm:$0xff] }
  0x6a   : > { %v544_v41 = vmul.f32 %v1508_v10, %v1095_v42  ;;  %v868_v43 = vadd.f32 %v836_v27, %v770_v34  ;;  %v673_v17 = vadd.f32 %v641_v29, %v575_v36  ;;  %v478_v47 = vadd.f32 %v446_v18, %v348_v9  ;;  %v1831_v34 = vld [vmem:[#allocation2 + $0x109] sm:$0xff] }
  0x6b   : > { %v1064_v16 = vadd.f32 %v1032_v20, %v966_v33  ;;  %v1131_v39 = vmul.f32 %v1579_v59, %v1097_v35  ;;  %v837_v48 = vmul.f32 %v1547_v37, %v1777_v2  ;;  %v642_v26 = vmul.f32 %v1526_v23, %v901_v14  ;;  %v1002_v33 = vld [vmem:[#allocation2 + $0x108] sm:$0xff] }
  0x6c   : > { %v349_v51 = vmul.f32 %v1497_v6, %v900_v57  ;;  %v967_v42 = vadd.f32 %v935_v38, %v868_v43  ;;  %v771_v52 = vadd.f32 %v739_v54, %v673_v17  ;;  %v576_v61 = vadd.f32 %v544_v41, %v478_v47 }
  0x6d   : > { %v1162_v58 = vadd.f32 %v1130_v53, %v1064_v16  ;;  %v936_v32 = vmul.f32 %v1555_v44, %v902_v28  ;;  %v1034_v63 = vmul.f32 %v1566_v50, %v1000_v19  ;;  %v1132_v56 = vmul.f32 %v1579_v59, %v1802_v46 }
  0x6e   : > { %v447_v30 = vmul.f32 %v1503_v8, %v998_v0  ;;  %v1065_v3 = vadd.f32 %v1033_v40, %v967_v42  ;;  %v869_v49 = vadd.f32 %v837_v48, %v771_v52  ;;  %v674_v4 = vadd.f32 %v642_v26, %v576_v61 }
  0x6f   : > { %1194 = vst.msk [vmem:[%s1714_s14 + $0x40] sm:$0xff] %vm192_vm0, %v1162_v58  ;;  %v740_v57 = vmul.f32 %v1537_v31, %v999_v24  ;;  %v838_v7 = vmul.f32 %v1547_v37, %v1097_v35  ;;  %v937_v45 = vmul.f32 %v1555_v44, %v903_v62  ;;  %v545_v13 = vmul.f32 %v1508_v10, %v1777_v2  ;;  %v1003_v58 = vld [vmem:[#allocation2 + $0x110] sm:$0xff] }
  0x70   : > { %v479_v12 = vadd.f32 %v447_v30, %v349_v51  ;;  %v1163_v15 = vadd.f32 %v1131_v39, %v1065_v3  ;;  %v968_v0 = vadd.f32 %v936_v32, %v869_v49  ;;  %v350_v53 = vmul.f32 %v1497_v6, %v901_v14  ;;  %v1101_v3 = vld [vmem:[#allocation2 + $0x111] sm:$0xff] }
  0x71   : > { %v772_v20 = vadd.f32 %v740_v57, %v674_v4  ;;  %v1035_v60 = vmul.f32 %v1566_v50, %v1001_v5  ;;  %v643_v21 = vmul.f32 %v1526_v23, %v902_v28  ;;  %v448_v22 = vmul.f32 %v1503_v8, %v999_v24 }
  0x72   : > { %v577_v55 = vadd.f32 %v545_v13, %v479_v12  ;;  %1195 = vst.msk [vmem:[%s1714_s14 + $0x48] sm:$0xff] %vm192_vm0, %v1163_v15  ;;  %v1066_v1 = vadd.f32 %v1034_v63, %v968_v0  ;;  %v1133_v29 = vmul.f32 %v1579_v59, %v1099_v11  ;;  %v741_v2 = vmul.f32 %v1537_v31, %v1000_v19  ;;  %v1004_v0 = vld [vmem:[#allocation2 + $0x128] sm:$0xff] }
  0x73   : > { %v870_v27 = vadd.f32 %v838_v7, %v772_v20  ;;  %v839_v14 = vmul.f32 %v1547_v37, %v1802_v46  ;;  %v480_v36 = vadd.f32 %v448_v22, %v350_v53  ;;  %v546_v18 = vmul.f32 %v1508_v10, %v1097_v35  ;;  %v1856_v20 = vld [vmem:[#allocation2 + $0x129] sm:$0xff] }
  0x74   : > { %v675_v9 = vadd.f32 %v643_v21, %v577_v55  ;;  %v1164_v24 = vadd.f32 %v1132_v56, %v1066_v1  ;;  %v938_v40 = vmul.f32 %v1555_v44, %v904_v25  ;;  %v351_v54 = vmul.f32 %v1497_v6, %v902_v28  ;;  %v905_v28 = vld [vmem:[#allocation2 + $0x10f] sm:$0xff] }
  0x75   : > { %v969_v38 = vadd.f32 %v937_v45, %v870_v27  ;;  %v578_v16 = vadd.f32 %v546_v18, %v480_v36  ;;  %v644_v43 = vmul.f32 %v1526_v23, %v903_v62  ;;  %v449_v17 = vmul.f32 %v1503_v8, %v1000_v19 }
  0x76   : > { %v773_v41 = vadd.f32 %v741_v2, %v675_v9  ;;  %1196 = vst.msk [vmem:[%s1714_s14 + $0x50] sm:$0xff] %vm192_vm0, %v1164_v24  ;;  %v1036_v39 = vmul.f32 %v1566_v50, %v1002_v33  ;;  %v1134_v35 = vmul.f32 %v1579_v59, %v1831_v34  ;;  %v742_v48 = vmul.f32 %v1537_v31, %v1001_v5 }
  0x77   : > { %v1067_v47 = vadd.f32 %v1035_v60, %v969_v38  ;;  %v676_v51 = vadd.f32 %v644_v43, %v578_v16  ;;  %v481_v42 = vadd.f32 %v449_v17, %v351_v54  ;;  %v547_v52 = vmul.f32 %v1508_v10, %v1802_v46  ;;  %v1103_v16 = vld [vmem:[#allocation2 + $0x131] sm:$0xff] }
  0x78   : > { %v871_v26 = vadd.f32 %v839_v14, %v773_v41  ;;  %v840_v61 = vmul.f32 %v1547_v37, %v1099_v11  ;;  %v645_v32 = vmul.f32 %v1526_v23, %v904_v25  ;;  %v352_v63 = vmul.f32 %v1497_v6, %v903_v62  ;;  %v906_v62 = vld [vmem:[#allocation2 + $0x127] sm:$0xff] }
  0x79   : > { %v1165_v19 = vadd.f32 %v1133_v29, %v1067_v47  ;;  %v774_v30 = vadd.f32 %v742_v48, %v676_v51  ;;  %v579_v49 = vadd.f32 %v547_v52, %v481_v42  ;;  %v450_v4 = vmul.f32 %v1503_v8, %v1001_v5  ;;  %v907_v29 = vld [vmem:[#allocation2 + $0x12f] sm:$0xff]  ;;  %v908_v42 = vld [vmem:[#allocation2 + $0x147] sm:$0xff] }
  0x7a   : > { %v970_v56 = vadd.f32 %v938_v40, %v871_v26  ;;  %v939_v57 = vmul.f32 %v1555_v44, %v905_v28  ;;  %v1037_v7 = vmul.f32 %v1566_v50, %v1003_v58  ;;  %v743_v46 = vmul.f32 %v1537_v31, %v1002_v33  ;;  %v1005_v40 = vld [vmem:[#allocation2 + $0x130] sm:$0xff] }
  0x7b   : > { %1197 = vst.msk [vmem:[%s1714_s14 + $0x58] sm:$0xff] %vm192_vm0, %v1165_v19  ;;  %v548_v45 = vmul.f32 %v1508_v10, %v1099_v11  ;;  %v872_v13 = vadd.f32 %v840_v61, %v774_v30  ;;  %v677_v15 = vadd.f32 %v645_v32, %v579_v49  ;;  %v482_v53 = vadd.f32 %v450_v4, %v352_v63  ;;  %v1885_v30 = vld [vmem:[#allocation2 + $0x149] sm:$0xff] }
  0x7c   : > { %v1068_v12 = vadd.f32 %v1036_v39, %v970_v56  ;;  %v1135_v5 = vmul.f32 %v1579_v59, %v1101_v3  ;;  %v841_v60 = vmul.f32 %v1547_v37, %v1831_v34  ;;  %v646_v55 = vmul.f32 %v1526_v23, %v905_v28  ;;  %v1006_v56 = vld [vmem:[#allocation2 + $0x148] sm:$0xff] }
  0x7d   : > { %v353_v21 = vmul.f32 %v1497_v6, %v904_v25  ;;  %v971_v11 = vadd.f32 %v939_v57, %v872_v13  ;;  %v775_v1 = vadd.f32 %v743_v46, %v677_v15  ;;  %v580_v27 = vadd.f32 %v548_v45, %v482_v53 }
  0x7e   : > { %v1166_v22 = vadd.f32 %v1134_v35, %v1068_v12  ;;  %v940_v2 = vmul.f32 %v1555_v44, %v906_v62  ;;  %v1038_v9 = vmul.f32 %v1566_v50, %v1004_v0  ;;  %v1136_v14 = vmul.f32 %v1579_v59, %v1856_v20 }
  0x7f   : > { %v451_v36 = vmul.f32 %v1503_v8, %v1002_v33  ;;  %v1069_v18 = vadd.f32 %v1037_v7, %v971_v11  ;;  %v873_v24 = vadd.f32 %v841_v60, %v775_v1  ;;  %v678_v38 = vadd.f32 %v646_v55, %v580_v27 }
  0x80   : > { %1198 = vst.msk [vmem:[%s1714_s14 + $0x60] sm:$0xff] %vm192_vm0, %v1166_v22  ;;  %v744_v25 = vmul.f32 %v1537_v31, %v1003_v58  ;;  %v842_v54 = vmul.f32 %v1547_v37, %v1101_v3  ;;  %v941_v41 = vmul.f32 %v1555_v44, %v907_v29  ;;  %v549_v17 = vmul.f32 %v1508_v10, %v1831_v34  ;;  %v1007_v22 = vld [vmem:[#allocation2 + $0x150] sm:$0xff] }
  0x81   : > { %v483_v43 = vadd.f32 %v451_v36, %v353_v21  ;;  %v1167_v47 = vadd.f32 %v1135_v5, %v1069_v18  ;;  %v972_v33 = vadd.f32 %v940_v2, %v873_v24  ;;  %v354_v35 = vmul.f32 %v1497_v6, %v905_v28  ;;  %v1105_v18 = vld [vmem:[#allocation2 + $0x151] sm:$0xff] }
  0x82   : > { %v776_v39 = vadd.f32 %v744_v25, %v678_v38  ;;  %v1039_v48 = vmul.f32 %v1566_v50, %v1005_v40  ;;  %v647_v51 = vmul.f32 %v1526_v23, %v906_v62  ;;  %v452_v52 = vmul.f32 %v1503_v8, %v1003_v58 }
  0x83   : > { %v581_v26 = vadd.f32 %v549_v17, %v483_v43  ;;  %1199 = vst.msk [vmem:[%s1714_s14 + $0x68] sm:$0xff] %vm192_vm0, %v1167_v47  ;;  %v1070_v19 = vadd.f32 %v1038_v9, %v972_v33  ;;  %v1137_v32 = vmul.f32 %v1579_v59, %v1103_v16  ;;  %v745_v34 = vmul.f32 %v1537_v31, %v1004_v0  ;;  %v1008_v33 = vld [vmem:[#allocation2 + $0x168] sm:$0xff] }
  0x84   : > { %v874_v61 = vadd.f32 %v842_v54, %v776_v39  ;;  %v843_v28 = vmul.f32 %v1547_v37, %v1856_v20  ;;  %v484_v49 = vadd.f32 %v452_v52, %v354_v35  ;;  %v550_v4 = vmul.f32 %v1508_v10, %v1101_v3  ;;  %v1910_v39 = vld [vmem:[#allocation2 + $0x169] sm:$0xff] }
  0x85   : > { %v679_v63 = vadd.f32 %v647_v51, %v581_v26  ;;  %v1168_v58 = vadd.f32 %v1136_v14, %v1070_v19  ;;  %v942_v7 = vmul.f32 %v1555_v44, %v908_v42  ;;  %v355_v46 = vmul.f32 %v1497_v6, %v906_v62  ;;  %v909_v62 = vld [vmem:[#allocation2 + $0x14f] sm:$0xff] }
  0x86   : > { %v973_v57 = vadd.f32 %v941_v41, %v874_v61  ;;  %v582_v12 = vadd.f32 %v550_v4, %v484_v49  ;;  %v648_v13 = vmul.f32 %v1526_v23, %v907_v29  ;;  %v453_v15 = vmul.f32 %v1503_v8, %v1004_v0 }
  0x87   : > { %v777_v45 = vadd.f32 %v745_v34, %v679_v63  ;;  %1200 = vst.msk [vmem:[%s1714_s14 + $0x70] sm:$0xff] %vm192_vm0, %v1168_v58  ;;  %v1040_v5 = vmul.f32 %v1566_v50, %v1006_v56  ;;  %v1138_v3 = vmul.f32 %v1579_v59, %v1885_v30  ;;  %v746_v60 = vmul.f32 %v1537_v31, %v1005_v40 }
  0x88   : > { %v1071_v53 = vadd.f32 %v1039_v48, %v973_v57  ;;  %v680_v21 = vadd.f32 %v648_v13, %v582_v12  ;;  %v485_v11 = vadd.f32 %v453_v15, %v355_v46  ;;  %v551_v1 = vmul.f32 %v1508_v10, %v1856_v20  ;;  %v1107_v12 = vld [vmem:[#allocation2 + $0x171] sm:$0xff] }
  0x89   : > { %v875_v55 = vadd.f32 %v843_v28, %v777_v45  ;;  %v844_v27 = vmul.f32 %v1547_v37, %v1103_v16  ;;  %v649_v2 = vmul.f32 %v1526_v23, %v908_v42  ;;  %v356_v9 = vmul.f32 %v1497_v6, %v907_v29  ;;  %v910_v29 = vld [vmem:[#allocation2 + $0x167] sm:$0xff] }
  0x8a   : > { %v1169_v0 = vadd.f32 %v1137_v32, %v1071_v53  ;;  %v778_v36 = vadd.f32 %v746_v60, %v680_v21  ;;  %v583_v24 = vadd.f32 %v551_v1, %v485_v11  ;;  %v454_v38 = vmul.f32 %v1503_v8, %v1005_v40  ;;  %v911_v32 = vld [vmem:[#allocation2 + $0x16f] sm:$0xff]  ;;  %v912_v11 = vld [vmem:[#allocation2 + $0x187] sm:$0xff] }
  0x8b   : > { %v974_v14 = vadd.f32 %v942_v7, %v875_v55  ;;  %v943_v25 = vmul.f32 %v1555_v44, %v909_v62  ;;  %v1041_v54 = vmul.f32 %v1566_v50, %v1007_v22  ;;  %v747_v20 = vmul.f32 %v1537_v31, %v1006_v56  ;;  %v1009_v7 = vld [vmem:[#allocation2 + $0x170] sm:$0xff] }
  0x8c   : > { %1201 = vst.msk [vmem:[%s1714_s14 + $0x78] sm:$0xff] %vm192_vm0, %v1169_v0  ;;  %v552_v41 = vmul.f32 %v1508_v10, %v1103_v16  ;;  %v876_v17 = vadd.f32 %v844_v27, %v778_v36  ;;  %v681_v47 = vadd.f32 %v649_v2, %v583_v24  ;;  %v486_v35 = vadd.f32 %v454_v38, %v356_v9 }
  0x8d   : > { %v1072_v43 = vadd.f32 %v1040_v5, %v974_v14  ;;  %v1139_v40 = vmul.f32 %v1579_v59, %v1105_v18  ;;  %v845_v48 = vmul.f32 %v1547_v37, %v1885_v30  ;;  %v650_v26 = vmul.f32 %v1526_v23, %v909_v62  ;;  %v1939_v14 = vld [vmem:[#allocation2 + $0x189] sm:$0xff] }
  0x8e   : > { %v357_v51 = vmul.f32 %v1497_v6, %v908_v42  ;;  %v975_v16 = vadd.f32 %v943_v25, %v876_v17  ;;  %v779_v19 = vadd.f32 %v747_v20, %v681_v47  ;;  %v584_v61 = vadd.f32 %v552_v41, %v486_v35  ;;  %v1946_v25 = vld [vmem:[%s2143_s1] ss:$0 sm:$0xff]  ;;  %v1953_v17 = vld [vmem:[%s2143_s1 + $0x1] ss:$0 sm:$0xff] }
  0x8f   : > { %v1170_v52 = vadd.f32 %v1138_v3, %v1072_v43  ;;  %v944_v34 = vmul.f32 %v1555_v44, %v910_v29  ;;  %v1042_v63 = vmul.f32 %v1566_v50, %v1008_v33  ;;  %v1140_v28 = vmul.f32 %v1579_v59, %v1910_v39 }
  0x90   : > { %v455_v49 = vmul.f32 %v1503_v8, %v1006_v56  ;;  %v1073_v4 = vadd.f32 %v1041_v54, %v975_v16  ;;  %v877_v58 = vadd.f32 %v845_v48, %v779_v19  ;;  %v682_v57 = vadd.f32 %v650_v26, %v584_v61  ;;  %v913_v26 = vld [vmem:[#allocation2 + $0x18f] sm:$0xff] }
  0x91   : > { %1202 = vst.msk [vmem:[%s1714_s14 + $0x80] sm:$0xff] %vm192_vm0, %v1170_v52  ;;  %v748_v42 = vmul.f32 %v1537_v31, %v1007_v22  ;;  %v846_v46 = vmul.f32 %v1547_v37, %v1105_v18  ;;  %v945_v45 = vmul.f32 %v1555_v44, %v911_v32  ;;  %v553_v15 = vmul.f32 %v1508_v10, %v1885_v30 }
  0x92   : > { %v487_v13 = vadd.f32 %v455_v49, %v357_v51  ;;  %v1171_v53 = vadd.f32 %v1139_v40, %v1073_v4  ;;  %v976_v56 = vadd.f32 %v944_v34, %v877_v58  ;;  %v358_v3 = vmul.f32 %v1497_v6, %v909_v62  ;;  %v1010_v62 = vld [vmem:[#allocation2 + $0x188] sm:$0xff]  ;;  %v1011_v51 = vld [vmem:[#allocation2 + $0x190] sm:$0xff] }
  0x93   : > { %v780_v5 = vadd.f32 %v748_v42, %v682_v57  ;;  %v1043_v60 = vmul.f32 %v1566_v50, %v1009_v7  ;;  %v651_v21 = vmul.f32 %v1526_v23, %v910_v29  ;;  %v456_v1 = vmul.f32 %v1503_v8, %v1007_v22  ;;  %v1972_v4 = vld [vmem:[#allocation2 + $0x191] sm:$0xff] }
  0x94   : > { %v585_v55 = vadd.f32 %v553_v15, %v487_v13  ;;  %1203 = vst.msk [vmem:[%s1714_s14 + $0x88] sm:$0xff] %vm192_vm0, %v1171_v53  ;;  %v1074_v0 = vadd.f32 %v1042_v63, %v976_v56  ;;  %v1141_v2 = vmul.f32 %v1579_v59, %v1107_v12  ;;  %v749_v30 = vmul.f32 %v1537_v31, %v1008_v33  ;;  %v914_v13 = vld [vmem:[#allocation2 + $0x1a7] sm:$0xff] }
  0x95   : > { %v878_v27 = vadd.f32 %v846_v46, %v780_v5  ;;  %v847_v6 = vmul.f32 %v1547_v37, %v1910_v39  ;;  %v488_v36 = vadd.f32 %v456_v1, %v358_v3  ;;  %v554_v24 = vmul.f32 %v1508_v10, %v1105_v18  ;;  %v1012_v15 = vld [vmem:[#allocation2 + $0x1a8] sm:$0xff] }
  0x96   : > { %v683_v9 = vadd.f32 %v651_v21, %v585_v55  ;;  %v1172_v8 = vadd.f32 %v1140_v28, %v1074_v0  ;;  %v946_v38 = vmul.f32 %v1555_v44, %v912_v11  ;;  %v359_v54 = vmul.f32 %v1946_v25, %v910_v29  ;;  %v1981_v53 = vld [vmem:[#allocation2 + $0x1a9] sm:$0xff] }
  0x97   : > { %v977_v22 = vadd.f32 %v945_v45, %v878_v27  ;;  %v586_v41 = vadd.f32 %v554_v24, %v488_v36  ;;  %v652_v43 = vmul.f32 %v1526_v23, %v911_v32  ;;  %v457_v10 = vmul.f32 %v1953_v17, %v1008_v33  ;;  %v1965_v33 = vld [vmem:[%s2143_s1 + $0x2] ss:$0 sm:$0xff]  ;;  %v915_v0 = vld [vmem:[#allocation2 + $0x1af] sm:$0xff]  ;;  %v2002_v27 = vld [vmem:[%s2143_s1 + $0x6] ss:$0 sm:$0xff] }
  0x98   : > { %v781_v20 = vadd.f32 %v749_v30, %v683_v9  ;;  %1204 = vst.msk [vmem:[%s1714_s14 + $0x90] sm:$0xff] %vm192_vm0, %v1172_v8  ;;  %v1044_v47 = vmul.f32 %v1566_v50, %v1010_v62  ;;  %v1142_v35 = vmul.f32 %v1579_v59, %v1939_v14  ;;  %v750_v29 = vmul.f32 %v1537_v31, %v1009_v7  ;;  %v2014_v8 = vld [vmem:[%s2143_s1 + $0x4] ss:$0 sm:$0xff] }
  0x99   : > { %v1075_v18 = vadd.f32 %v1043_v60, %v977_v22  ;;  %v684_v48 = vadd.f32 %v652_v43, %v586_v41  ;;  %v489_v52 = vadd.f32 %v457_v10, %v359_v54  ;;  %v555_v16 = vmul.f32 %v1965_v33, %v1910_v39 }
  0x9a   : > { %v879_v40 = vadd.f32 %v847_v6, %v781_v20  ;;  %v848_v61 = vmul.f32 %v1547_v37, %v1107_v12  ;;  %v653_v34 = vmul.f32 %v1526_v23, %v912_v11  ;;  %v360_v63 = vmul.f32 %v1946_v25, %v911_v32 }
  0x9b   : > { %v1173_v19 = vadd.f32 %v1141_v2, %v1075_v18  ;;  %v782_v49 = vadd.f32 %v750_v29, %v684_v48  ;;  %v587_v58 = vadd.f32 %v555_v16, %v489_v52  ;;  %v458_v57 = vmul.f32 %v1953_v17, %v1009_v7  ;;  %v916_v48 = vld [vmem:[#allocation2 + $0x1c7] sm:$0xff] }
  0x9c   : > { %v978_v28 = vadd.f32 %v946_v38, %v879_v40  ;;  %v947_v42 = vmul.f32 %v1555_v44, %v913_v26  ;;  %v1045_v39 = vmul.f32 %v1566_v50, %v1011_v51  ;;  %v751_v46 = vmul.f32 %v1537_v31, %v1010_v62  ;;  %v1988_v44 = vld [vmem:[%s2143_s1 + $0x5] ss:$0 sm:$0xff]  ;;  %v1013_v38 = vld [vmem:[#allocation2 + $0x1b0] sm:$0xff] }
  0x9d   : > { %1205 = vst.msk [vmem:[%s1714_s14 + $0x98] sm:$0xff] %vm192_vm0, %v1173_v19  ;;  %v556_v37 = vmul.f32 %v1965_v33, %v1107_v12  ;;  %v880_v45 = vadd.f32 %v848_v61, %v782_v49  ;;  %v685_v32 = vadd.f32 %v653_v34, %v587_v58  ;;  %v490_v56 = vadd.f32 %v458_v57, %v360_v63  ;;  %v1995_v12 = vld [vmem:[%s2143_s1 + $0x3] ss:$0 sm:$0xff] }
  0x9e   : > { %v1076_v23 = vadd.f32 %v1044_v47, %v978_v28  ;;  %v1143_v7 = vmul.f32 %v1579_v59, %v1972_v4  ;;  %v849_v31 = vmul.f32 %v1988_v44, %v1939_v14  ;;  %v654_v5 = vmul.f32 %v1995_v12, %v913_v26  ;;  %v2026_v47 = vld [vmem:[%s2143_s1 + $0x7] ss:$0 sm:$0xff]  ;;  %v1014_v28 = vld [vmem:[#allocation2 + $0x1c8] sm:$0xff] }
  0x9f   : > { %v361_v3 = vmul.f32 %v1946_v25, %v912_v11  ;;  %v979_v55 = vadd.f32 %v947_v42, %v880_v45  ;;  %v783_v21 = vadd.f32 %v751_v46, %v685_v32  ;;  %v588_v1 = vadd.f32 %v556_v37, %v490_v56 }
  0xa0   : > { %v1174_v60 = vadd.f32 %v1142_v35, %v1076_v23  ;;  %v948_v2 = vmul.f32 %v2002_v27, %v914_v13  ;;  %v1046_v30 = vmul.f32 %v1566_v50, %v1012_v15  ;;  %v1144_v9 = vmul.f32 %v1579_v59, %v1981_v53 }
  0xa1   : > { %v459_v6 = vmul.f32 %v1953_v17, %v1010_v62  ;;  %v1077_v11 = vadd.f32 %v1045_v39, %v979_v55  ;;  %v881_v36 = vadd.f32 %v849_v31, %v783_v21  ;;  %v686_v24 = vadd.f32 %v654_v5, %v588_v1  ;;  %v1111_v62 = vld [vmem:[#allocation2 + $0x1b1] sm:$0xff] }
  0xa2   : > { %1206 = vst.msk [vmem:[%s1714_s14 + $0xa0] sm:$0xff] %vm192_vm0, %v1174_v60  ;;  %v752_v22 = vmul.f32 %v2014_v8, %v1011_v51  ;;  %v850_v50 = vmul.f32 %v1988_v44, %v1972_v4  ;;  %v949_v59 = vmul.f32 %v2002_v27, %v915_v0  ;;  %v557_v20 = vmul.f32 %v1965_v33, %v1939_v14  ;;  %v1015_v60 = vld [vmem:[#allocation2 + $0x1d0] sm:$0xff] }
  0xa3   : > { %v491_v54 = vadd.f32 %v459_v6, %v361_v3  ;;  %v1175_v41 = vadd.f32 %v1143_v7, %v1077_v11  ;;  %v980_v43 = vadd.f32 %v948_v2, %v881_v36  ;;  %v362_v18 = vmul.f32 %v1946_v25, %v913_v26  ;;  %v2036_v26 = vld [vmem:[%s2143_s1 + $0x8] ss:$0 sm:$0xff]  ;;  %v1113_v11 = vld [vmem:[#allocation2 + $0x1d1] sm:$0xff] }
  0xa4   : > { %v784_v10 = vadd.f32 %v752_v22, %v686_v24  ;;  %v1047_v35 = vmul.f32 %v2026_v47, %v1013_v38  ;;  %v655_v40 = vmul.f32 %v1995_v12, %v914_v13  ;;  %v460_v52 = vmul.f32 %v1953_v17, %v1011_v51  ;;  %v2042_v51 = vld [vmem:[#allocation2 + $0x1c9] sm:$0xff] }
  0xa5   : > { %v589_v29 = vadd.f32 %v557_v20, %v491_v54  ;;  %1207 = vst.msk [vmem:[%s1714_s14 + $0xa8] sm:$0xff] %vm192_vm0, %v1175_v41  ;;  %v1078_v14 = vadd.f32 %v1046_v30, %v980_v43  ;;  %v1145_v19 = vmul.f32 %v2036_v26, %v1111_v62  ;;  %v753_v61 = vmul.f32 %v2014_v8, %v1012_v15  ;;  %v1016_v43 = vld [vmem:[#allocation2 + $0x1e8] sm:$0xff] }
  0xa6   : > { %v882_v16 = vadd.f32 %v850_v50, %v784_v10  ;;  %v851_v63 = vmul.f32 %v1988_v44, %v1981_v53  ;;  %v492_v49 = vadd.f32 %v460_v52, %v362_v18  ;;  %v558_v58 = vmul.f32 %v1965_v33, %v1972_v4  ;;  %v1114_v10 = vld [vmem:[#allocation2 + $0x1e9] sm:$0xff] }
  0xa7   : > { %v687_v34 = vadd.f32 %v655_v40, %v589_v29  ;;  %v1176_v57 = vadd.f32 %v1144_v9, %v1078_v14  ;;  %v950_v39 = vmul.f32 %v2002_v27, %v916_v48  ;;  %v363_v46 = vmul.f32 %v1946_v25, %v914_v13  ;;  %v917_v13 = vld [vmem:[#allocation2 + $0x1cf] sm:$0xff] }
  0xa8   : > { %v981_v42 = vadd.f32 %v949_v59, %v882_v16  ;;  %v590_v23 = vadd.f32 %v558_v58, %v492_v49  ;;  %v656_v45 = vmul.f32 %v1995_v12, %v915_v0  ;;  %v461_v32 = vmul.f32 %v1953_v17, %v1012_v15 }
  0xa9   : > { %v785_v37 = vadd.f32 %v753_v61, %v687_v34  ;;  %1208 = vst.msk [vmem:[%s1714_s14 + $0xb0] sm:$0xff] %vm192_vm0, %v1176_v57  ;;  %v1048_v7 = vmul.f32 %v2026_v47, %v1014_v28  ;;  %v1146_v4 = vmul.f32 %v2036_v26, %v2042_v51  ;;  %v754_v31 = vmul.f32 %v2014_v8, %v1013_v38 }
  0xaa   : > { %v1079_v56 = vadd.f32 %v1047_v35, %v981_v42  ;;  %v688_v3 = vadd.f32 %v656_v45, %v590_v23  ;;  %v493_v55 = vadd.f32 %v461_v32, %v363_v46  ;;  %v559_v21 = vmul.f32 %v1965_v33, %v1981_v53  ;;  %v1115_v23 = vld [vmem:[#allocation2 + $0x1f1] sm:$0xff] }
  0xab   : > { %v883_v5 = vadd.f32 %v851_v63, %v785_v37  ;;  %v852_v1 = vmul.f32 %v1988_v44, %v1111_v62  ;;  %v657_v2 = vmul.f32 %v1995_v12, %v916_v48  ;;  %v364_v30 = vmul.f32 %v1946_v25, %v915_v0  ;;  %v918_v0 = vld [vmem:[#allocation2 + $0x1e7] sm:$0xff] }
  0xac   : > { %v1177_v15 = vadd.f32 %v1145_v19, %v1079_v56  ;;  %v786_v6 = vadd.f32 %v754_v31, %v688_v3  ;;  %v591_v36 = vadd.f32 %v559_v21, %v493_v55  ;;  %v462_v24 = vmul.f32 %v1953_v17, %v1013_v38  ;;  %v919_v19 = vld [vmem:[#allocation2 + $0x1ef] sm:$0xff]  ;;  %v920_v55 = vld [vmem:[#allocation2 + $0x207] sm:$0xff] }
  0xad   : > { %v982_v9 = vadd.f32 %v950_v39, %v883_v5  ;;  %v951_v22 = vmul.f32 %v2002_v27, %v917_v13  ;;  %v1049_v50 = vmul.f32 %v2026_v47, %v1015_v60  ;;  %v755_v53 = vmul.f32 %v2014_v8, %v1014_v28  ;;  %v1017_v39 = vld [vmem:[#allocation2 + $0x1f0] sm:$0xff] }
  0xae   : > { %1209 = vst.msk [vmem:[%s1714_s14 + $0xb8] sm:$0xff] %vm192_vm0, %v1177_v15  ;;  %v560_v59 = vmul.f32 %v1965_v33, %v1111_v62  ;;  %v884_v20 = vadd.f32 %v852_v1, %v786_v6  ;;  %v689_v41 = vadd.f32 %v657_v2, %v591_v36  ;;  %v494_v18 = vadd.f32 %v462_v24, %v364_v30 }
  0xaf   : > { %v1080_v54 = vadd.f32 %v1048_v7, %v982_v9  ;;  %v1147_v38 = vmul.f32 %v2036_v26, %v1113_v11  ;;  %v853_v35 = vmul.f32 %v1988_v44, %v2042_v51  ;;  %v658_v29 = vmul.f32 %v1995_v12, %v917_v13  ;;  %v1018_v9 = vld [vmem:[#allocation2 + $0x208] sm:$0xff] }
  0xb0   : > { %v365_v40 = vmul.f32 %v1946_v25, %v916_v48  ;;  %v983_v14 = vadd.f32 %v951_v22, %v884_v20  ;;  %v787_v62 = vadd.f32 %v755_v53, %v689_v41  ;;  %v592_v16 = vadd.f32 %v560_v59, %v494_v18  ;;  %v1116_v59 = vld [vmem:[#allocation2 + $0x209] sm:$0xff] }
  0xb1   : > { %v1178_v52 = vadd.f32 %v1146_v4, %v1080_v54  ;;  %v952_v61 = vmul.f32 %v2002_v27, %v918_v0  ;;  %v1050_v34 = vmul.f32 %v2026_v47, %v1016_v43  ;;  %v1148_v63 = vmul.f32 %v2036_v26, %v1114_v10 }
  0xb2   : > { %v463_v49 = vmul.f32 %v1953_v17, %v1014_v28  ;;  %v1081_v58 = vadd.f32 %v1049_v50, %v983_v14  ;;  %v885_v57 = vadd.f32 %v853_v35, %v787_v62  ;;  %v690_v42 = vadd.f32 %v658_v29, %v592_v16 }
  0xb3   : > { %1210 = vst.msk [vmem:[%s1714_s14 + $0xc0] sm:$0xff] %vm192_vm0, %v1178_v52  ;;  %v756_v48 = vmul.f32 %v2014_v8, %v1015_v60  ;;  %v854_v46 = vmul.f32 %v1988_v44, %v1113_v11  ;;  %v953_v37 = vmul.f32 %v2002_v27, %v919_v19  ;;  %v561_v32 = vmul.f32 %v1965_v33, %v2042_v51 }
  0xb4   : > { %v495_v45 = vadd.f32 %v463_v49, %v365_v40  ;;  %v1179_v56 = vadd.f32 %v1147_v38, %v1081_v58  ;;  %v984_v28 = vadd.f32 %v952_v61, %v885_v57  ;;  %v366_v4 = vmul.f32 %v1946_v25, %v917_v13  ;;  %v1019_v49 = vld [vmem:[#allocation2 + $0x210] sm:$0xff]  ;;  %v922_v57 = vld [vmem:[#allocation2 + $0x227] sm:$0xff] }
  0xb5   : > { %v788_v7 = vadd.f32 %v756_v48, %v690_v42  ;;  %v1051_v31 = vmul.f32 %v2026_v47, %v1017_v39  ;;  %v659_v3 = vmul.f32 %v1995_v12, %v918_v0  ;;  %v464_v21 = vmul.f32 %v1953_v17, %v1015_v60 }
  0xb6   : > { %v593_v5 = vadd.f32 %v561_v32, %v495_v45  ;;  %1211 = vst.msk [vmem:[%s1714_s14 + $0xc8] sm:$0xff] %vm192_vm0, %v1179_v56  ;;  %v1082_v15 = vadd.f32 %v1050_v34, %v984_v28  ;;  %v1149_v2 = vmul.f32 %v2036_v26, %v1115_v23  ;;  %v757_v51 = vmul.f32 %v2014_v8, %v1016_v43 }
  0xb7   : > { %v886_v1 = vadd.f32 %v854_v46, %v788_v7  ;;  %v855_v13 = vmul.f32 %v1988_v44, %v1114_v10  ;;  %v496_v6 = vadd.f32 %v464_v21, %v366_v4  ;;  %v562_v36 = vmul.f32 %v1965_v33, %v1113_v11 }
  0xb8   : > { %v691_v30 = vadd.f32 %v659_v3, %v593_v5  ;;  %v1180_v24 = vadd.f32 %v1148_v63, %v1082_v15  ;;  %v954_v60 = vmul.f32 %v2002_v27, %v920_v55  ;;  %v367_v50 = vmul.f32 %v1946_v25, %v918_v0  ;;  %v921_v0 = vld [vmem:[#allocation2 + $0x20f] sm:$0xff] }
  0xb9   : > { %v985_v22 = vadd.f32 %v953_v37, %v886_v1  ;;  %v594_v54 = vadd.f32 %v562_v36, %v496_v6  ;;  %v660_v20 = vmul.f32 %v1995_v12, %v919_v19  ;;  %v465_v41 = vmul.f32 %v1953_v17, %v1016_v43  ;;  %v1020_v5 = vld [vmem:[#allocation2 + $0x228] sm:$0xff]  ;;  %v1021_v36 = vld [vmem:[#allocation2 + $0x230] sm:$0xff] }
  0xba   : > { %v789_v53 = vadd.f32 %v757_v51, %v691_v30  ;;  %1212 = vst.msk [vmem:[%s1714_s14 + $0xd0] sm:$0xff] %vm192_vm0, %v1180_v24  ;;  %v1052_v38 = vmul.f32 %v2026_v47, %v1018_v9  ;;  %v758_v11 = vmul.f32 %v2014_v8, %v1017_v39  ;;  %v563_v35 = vmul.f32 %v1965_v33, %v1114_v10 }
  0xbb   : > { %v1083_v18 = vadd.f32 %v1051_v31, %v985_v22  ;;  %v692_v40 = vadd.f32 %v660_v20, %v594_v54  ;;  %v497_v52 = vadd.f32 %v465_v41, %v367_v50  ;;  %v661_v14 = vmul.f32 %v1995_v12, %v920_v55 }
  0xbc   : > { %v887_v29 = vadd.f32 %v855_v13, %v789_v53  ;;  %v1150_v16 = vmul.f32 %v2036_v26, %v1116_v59  ;;  %v856_v43 = vmul.f32 %v1988_v44, %v1115_v23  ;;  %v368_v61 = vmul.f32 %v1946_v25, %v919_v19  ;;  %v1117_v19 = vld [vmem:[#allocation2 + $0x211] sm:$0xff] }
  0xbd   : > { %v1181_v62 = vadd.f32 %v1149_v2, %v1083_v18  ;;  %v790_v63 = vadd.f32 %v758_v11, %v692_v40  ;;  %v595_v58 = vadd.f32 %v563_v35, %v497_v52  ;;  %v466_v10 = vmul.f32 %v1953_v17, %v1017_v39  ;;  %v1118_v2 = vld [vmem:[#allocation2 + $0x229] sm:$0xff] }
  0xbe   : > { %v986_v34 = vadd.f32 %v954_v60, %v887_v29  ;;  %v955_v42 = vmul.f32 %v2002_v27, %v921_v0  ;;  %v759_v48 = vmul.f32 %v2014_v8, %v1018_v9  ;;  %v564_v46 = vmul.f32 %v1965_v33, %v1115_v23 }
  0xbf   : > { %1213 = vst.msk [vmem:[%s1714_s14 + $0xd8] sm:$0xff] %vm192_vm0, %v1181_v62  ;;  %v662_v37 = vmul.f32 %v1995_v12, %v921_v0  ;;  %v888_v25 = vadd.f32 %v856_v43, %v790_v63  ;;  %v693_v32 = vadd.f32 %v661_v14, %v595_v58  ;;  %v498_v56 = vadd.f32 %v466_v10, %v368_v61  ;;  %v923_v12 = vld [vmem:[#allocation2 + $0x22f] sm:$0xff] }
  0xc0   : > { %v1084_v45 = vadd.f32 %v1052_v38, %v986_v34  ;;  %v1053_v28 = vmul.f32 %v2026_v47, %v1019_v49  ;;  %v857_v17 = vmul.f32 %v1988_v44, %v1116_v59  ;;  %v956_v39 = vmul.f32 %v2002_v27, %v922_v57 }
  0xc1   : > { %v987_v4 = vadd.f32 %v955_v42, %v888_v25  ;;  %v791_v31 = vadd.f32 %v759_v48, %v693_v32  ;;  %v596_v3 = vadd.f32 %v564_v46, %v498_v56  ;;  %v1151_v33 = vmul.f32 %v2036_v26, %v1117_v19 }
  0xc2   : > { %v1182_v7 = vadd.f32 %v1150_v16, %v1084_v45  ;;  %v760_v15 = vmul.f32 %v2014_v8, %v1019_v49  ;;  %v1054_v1 = vmul.f32 %v2026_v47, %v1020_v5  ;;  %v858_v51 = vmul.f32 %v1988_v44, %v1117_v19  ;;  %v1119_v8 = vld [vmem:[#allocation2 + $0x231] sm:$0xff] }
  0xc3   : > { %v1085_v23 = vadd.f32 %v1053_v28, %v987_v4  ;;  %v889_v55 = vadd.f32 %v857_v17, %v791_v31  ;;  %v694_v21 = vadd.f32 %v662_v37, %v596_v3  ;;  %v957_v6 = vmul.f32 %v2002_v27, %v923_v12 }
  0xc4   : > { %1214 = vst.msk [vmem:[%s1714_s14 + $0xe0] sm:$0xff] %vm192_vm0, %v1182_v7  ;;  %v1152_v22 = vmul.f32 %v2036_v26, %v1118_v2  ;;  %v1055_v59 = vmul.f32 %v2026_v47, %v1021_v36  ;;  %v1153_v54 = vmul.f32 %v2036_v26, %v1119_v8 }
  0xc5   : > { %v1183_v30 = vadd.f32 %v1151_v33, %v1085_v23  ;;  %v988_v13 = vadd.f32 %v956_v39, %v889_v55  ;;  %v792_v9 = vadd.f32 %v760_v15, %v694_v21 }
  0xc7   : > { %1215 = vst.msk [vmem:[%s1714_s14 + $0xe8] sm:$0xff] %vm192_vm0, %v1183_v30  ;;  %v1086_v24 = vadd.f32 %v1054_v1, %v988_v13  ;;  %v890_v60 = vadd.f32 %v858_v51, %v792_v9 }
  0xc9   : > { %v1184_v50 = vadd.f32 %v1152_v22, %v1086_v24  ;;  %v989_v53 = vadd.f32 %v957_v6, %v890_v60 }
  0xcb   : > { %1216 = vst.msk [vmem:[%s1714_s14 + $0xf0] sm:$0xff] %vm192_vm0, %v1184_v50  ;;  %v1087_v44 = vadd.f32 %v1055_v59, %v989_v53 }
  0xcd   : > { %v1185_v20 = vadd.f32 %v1153_v54, %v1087_v44 }
  0xcf   : > { %1217 = vst.msk [vmem:[%s1714_s14 + $0xf8] sm:$0xff] %vm192_vm0, %v1185_v20 }
  0xd0 PF: > { %s12_s11 = sadd.s32 1, %s1396_s11   ;;  %s2145_s9 = smov %s1392_s10 }
  0xd1   : > { %p9_p5 = scmp.ge.s32.totalorder %s12_s11, 4   ;;  %s2146_s10 = smov %s2148_s12 }
  0xd3   :  { %11 = sbr.rel (!%p9_p5) target bundleno = 2 (0x2), region = 64 }

</bundles_post_ra>
